<compile_context>
chip_gen: v7x
topology: tpu7x:2x2x1
jax: 0.10.0
libtpu: 0.0.40
codegen_flags: <defaults>
</compile_context>

<pallas_src>
import functools
import math

import jax
import jax.numpy as jnp
from jax.experimental import pallas as pl
from jax.experimental.pallas import tpu as pltpu

_LANE = 128
_TARGET_BLOCK_BYTES = 2 * 1024 * 1024  # ~knee of the measured HBM-roofline curve per block

# Flipped to False (once) if the lane-dense epilogue fails to lower on this toolchain.
_DENSE_EPILOGUE_OK = True


def _round_up(x, m):
    return ((x + m - 1) // m) * m


def _cdiv(a, b):
    return -(-a // b)


def _per_row_loss(sq_dist, lab, *, margin, loss_type):
    """Elementwise contrastive loss from squared distances; works on any layout."""
    dist = jnp.sqrt(sq_dist)
    if loss_type == "margin":
        hinge = jnp.maximum(jnp.float32(margin) - dist, 0.0)
        return lab * (dist * dist) + (1.0 - lab) * (hinge * hinge)
    elif loss_type == "tanh":
        # Numerically stable |log(1-tanh(d))| and |log(tanh(d))| (both logs <= 0):
        #   log(1-tanh(d)) = log(2) - 2d - log1p(e^{-2d})
        #   log(tanh(d))   = log1p(-e^{-2d}) - log1p(e^{-2d})
        # NOTE: dist == 0 with label == 1 gives 0 * inf = NaN, exactly like the torch module.
        t = jnp.exp(-2.0 * dist)
        log1p_t = jnp.log1p(t)
        abs_log_1m_tanh = 2.0 * dist + log1p_t - jnp.float32(math.log(2.0))
        abs_log_tanh = log1p_t - jnp.log1p(-t)
        return lab * abs_log_1m_tanh + (1.0 - lab) * abs_log_tanh
    raise NotImplementedError(f"loss_type={loss_type!r}")


def _kernel_dense(o1_ref, o2_ref, lab_ref, out_ref, *, margin, loss_type, true_b, tb):
    """Lane-dense epilogue: per-element losses written as a (1, tb//128, 128) tile."""
    pid = pl.program_id(0)
    eps = jnp.float32(1e-6)  # torch F.pairwise_distance adds eps to the difference

    o1 = o1_ref[...].astype(jnp.float32)                     # (tb, d)
    o2 = o2_ref[...].astype(jnp.float32)
    diff = o1 - o2 + eps
    sq = diff * diff

    r = tb // _LANE
    d = o1.shape[-1]
    # Leading-dim split is layout-free; the reduce over the lane axis lands the per-row
    # squared distances lane-dense: row i -> (i // 128, i % 128).
    sq_dist = jnp.sum(sq.reshape(r, _LANE, d), axis=-1)      # (r, 128)
    lab = lab_ref[0]                                          # (r, 128), already f32

    per = _per_row_loss(sq_dist, lab, margin=margin, loss_type=loss_type)

    # Mask rows beyond the true batch (the ragged last block reads uninitialized VMEM).
    # Must stay a select (not a multiply) so garbage/NaN rows are discarded.
    sub = jax.lax.broadcasted_iota(jnp.int32, (r, _LANE), 0)
    lane = jax.lax.broadcasted_iota(jnp.int32, (r, _LANE), 1)
    row = pid * tb + sub * _LANE + lane
    per = jnp.where(row < true_b, per, 0.0)

    out_ref[0] = per                                          # lane-dense, unmasked store


def _kernel_column(o1_ref, o2_ref, lab_ref, out_ref, *, margin, loss_type, true_b, tb):
    """Fallback (lane-sparse column) epilogue: per-block partial sum in an (8,128) tile."""
    pid = pl.program_id(0)
    eps = jnp.float32(1e-6)

    o1 = o1_ref[...].astype(jnp.float32)                      # (tb, d)
    o2 = o2_ref[...].astype(jnp.float32)
    lab = lab_ref[...].astype(jnp.float32)                    # (tb, 1)

    diff = o1 - o2 + eps
    sq_dist = jnp.sum(diff * diff, axis=-1, keepdims=True)    # (tb, 1)
    per = _per_row_loss(sq_dist, lab, margin=margin, loss_type=loss_type)

    row = pid * tb + jax.lax.broadcasted_iota(jnp.int32, per.shape, 0)
    per = jnp.where(row < true_b, per, 0.0)                   # select, not multiply

    out_ref[...] = jnp.zeros(out_ref.shape, jnp.float32) + jnp.sum(per)


def _choose_block_rows(b, d, dsize, vmem_budget_bytes):
    # Rows whose 2 inputs x 2 pipeline buffers + ~3 f32-wide temporaries fit the budget.
    bytes_per_row_vmem = max(1, d * (4 * dsize + 12))
    tb_vmem = max(_LANE, vmem_budget_bytes // bytes_per_row_vmem)
    # Rows so each input block is ~_TARGET_BLOCK_BYTES (per-step overhead amortization).
    tb_target = max(_LANE, _TARGET_BLOCK_BYTES // max(1, d * dsize))
    tb = min(tb_vmem, tb_target)
    tb = max(_LANE, (tb // _LANE) * _LANE)
    # Never larger than the lane-rounded batch.
    tb = min(tb, _round_up(b, _LANE))
    # Prefer >=4 (else >=2) blocks when each block still keeps >=1024 rows: the 'parallel'
    # grid axis is what spreads work across v7x's two TensorCores (1 TC on v5e/v6e, where
    # the extra ~0.35us/step is negligible at these block sizes).
    if b >= 4 * 1024:
        tb = min(tb, _round_up(_cdiv(b, 4), _LANE))
    elif b >= 2 * 1024:
        tb = min(tb, _round_up(_cdiv(b, 2), _LANE))
    return max(_LANE, tb)


def contrastive_loss(output1, output2, label, *, margin=2.0, loss_type="margin",
                     metric="Euclide", block_rows=None):
    """Pallas-backed ContrastiveLoss.forward (metric='Euclide' only)."""
    global _DENSE_EPILOGUE_OK
    if metric != "Euclide":
        # TODO(synk): DTW / TWED / Wasserstein metrics have no Pallas equivalent.
        raise NotImplementedError(f"metric={metric!r} has no Pallas equivalent")
    if loss_type not in ("margin", "tanh"):
        raise NotImplementedError(f"loss_type={loss_type!r}")

    b, d = output1.shape
    dsize = jnp.dtype(output1.dtype).itemsize

    # Generation-aware VMEM limit / block budget.
    try:
        vmem_cap = int(pltpu.get_tpu_info().vmem_capacity_bytes)
    except Exception:
        vmem_cap = 64 * 1024 * 1024            # v7x-safe fallback
    vmem_limit = int(min((vmem_cap * 3) // 4, 96 * 1024 * 1024))

    if block_rows is None:
        tb = _choose_block_rows(b, d, dsize, int(vmem_limit * 0.6))
    else:
        tb = max(_LANE, _round_up(int(block_rows), _LANE))

    num_blocks = _cdiv(b, tb)                  # ragged last block handled by the row mask
    r = tb // _LANE

    kw = dict(margin=float(margin), loss_type=loss_type, true_b=b, tb=tb)
    compiler_params = pltpu.CompilerParams(
        dimension_semantics=("parallel",), vmem_limit_bytes=vmem_limit)
    io_specs = [pl.BlockSpec((tb, d), lambda i: (i, 0)),
                pl.BlockSpec((tb, d), lambda i: (i, 0))]

    lab_flat = label.reshape(-1).astype(jnp.float32)

    if _DENSE_EPILOGUE_OK:
        try:
            # Labels in the same lane-dense (block, R, 128) layout as the kernel epilogue;
            # padding B floats is negligible next to the B*D inputs.
            lab_dense = jnp.pad(lab_flat, (0, num_blocks * tb - b)).reshape(num_blocks, r, _LANE)
            out = pl.pallas_call(
                functools.partial(_kernel_dense, **kw),
                out_shape=jax.ShapeDtypeStruct((num_blocks, r, _LANE), jnp.float32),
                grid_spec=pltpu.PrefetchScalarGridSpec(
                    num_scalar_prefetch=0,
                    grid=(num_blocks,),
                    in_specs=io_specs + [pl.BlockSpec((1, r, _LANE), lambda i: (i, 0, 0))],
                    out_specs=pl.BlockSpec((1, r, _LANE), lambda i: (i, 0, 0)),
                ),
                compiler_params=compiler_params,
            )(output1, output2, lab_dense)
            loss = jnp.sum(out) / jnp.float32(b)
        except Exception:
            # Mosaic rejected the lane-dense reduce/relayout on this toolchain: fall back
            # (once) to the lane-sparse column epilogue, which is known to lower.
            _DENSE_EPILOGUE_OK = False

    if not _DENSE_EPILOGUE_OK:
        lab_col = lab_flat.reshape(b, 1)
        out = pl.pallas_call(
            functools.partial(_kernel_column, **kw),
            out_shape=jax.ShapeDtypeStruct((num_blocks * 8, _LANE), jnp.float32),
            grid_spec=pltpu.PrefetchScalarGridSpec(
                num_scalar_prefetch=0,
                grid=(num_blocks,),
                in_specs=io_specs + [pl.BlockSpec((tb, 1), lambda i: (i, 0))],
                out_specs=pl.BlockSpec((8, _LANE), lambda i: (i, 0)),
            ),
            compiler_params=compiler_params,
        )(output1, output2, lab_col)
        loss = jnp.sum(out[0::8, 0]) / jnp.float32(b)

    if loss_type == "tanh":
        loss = jnp.minimum(loss, jnp.float32(10000.0))
    return loss


def _reference(output1, output2, label, *, margin=2.0, loss_type="margin"):
    """Pure-JAX reference mirroring the torch module (stable tanh-log form)."""
    eps = 1e-6
    diff = output1.astype(jnp.float32) - output2.astype(jnp.float32) + eps
    dist = jnp.sqrt(jnp.sum(diff * diff, axis=-1))
    lab = label.reshape(-1).astype(jnp.float32)
    if loss_type == "margin":
        hinge = jnp.maximum(margin - dist, 0.0)
        return jnp.mean(lab * dist ** 2 + (1.0 - lab) * hinge ** 2)
    t = jnp.exp(-2.0 * dist)
    abs_log_1m_tanh = 2.0 * dist + jnp.log1p(t) - jnp.log(2.0)
    abs_log_tanh = jnp.log1p(t) - jnp.log1p(-t)
    loss = jnp.mean(lab * abs_log_1m_tanh + (1.0 - lab) * abs_log_tanh)
    return jnp.minimum(loss, 10000.0)


if __name__ == "__main__":
    key = jax.random.PRNGKey(0)
    margin = 2.0

    # Case 1: tiny batch, B not a multiple of the block -> single ragged (masked) block.
    k1, k2, k3, k4, k5, k6 = jax.random.split(key, 6)
    B, D = 10, 32
    o1 = 0.3 * jax.random.normal(k1, (B, D), dtype=jnp.float32)
    o2 = 0.3 * jax.random.normal(k2, (B, D), dtype=jnp.float32)
    lab = jax.random.bernoulli(k3, 0.5, (B,)).astype(jnp.float32)

    loss_m = contrastive_loss(o1, o2, lab, margin=margin, loss_type="margin")
    loss_t = contrastive_loss(o1, o2, lab, margin=margin, loss_type="tanh")
    jax.block_until_ready((loss_m, loss_t))

    ref_m = _reference(o1, o2, lab, margin=margin, loss_type="margin")
    ref_t = _reference(o1, o2, lab, margin=margin, loss_type="tanh")
    assert bool(jnp.isfinite(loss_m)) and bool(jnp.isfinite(loss_t)), (loss_m, loss_t)
    assert jnp.allclose(loss_m, ref_m, rtol=1e-5, atol=1e-5), (loss_m, ref_m)
    assert jnp.allclose(loss_t, ref_t, rtol=1e-5, atol=1e-5), (loss_t, ref_t)

    # Case 2: force multiple blocks + a ragged last block (exercises the 'parallel' grid
    # axis and the no-padding mask path) with a small explicit block override.
    B2, D2 = 300, 32
    p1 = 0.3 * jax.random.normal(k4, (B2, D2), dtype=jnp.float32)
    p2 = 0.3 * jax.random.normal(k5, (B2, D2), dtype=jnp.float32)
    lab2 = jax.random.bernoulli(k6, 0.5, (B2,)).astype(jnp.float32)

    loss2_m = contrastive_loss(p1, p2, lab2, margin=margin, loss_type="margin", block_rows=128)
    loss2_t = contrastive_loss(p1, p2, lab2, margin=margin, loss_type="tanh", block_rows=128)
    jax.block_until_ready((loss2_m, loss2_t))

    ref2_m = _reference(p1, p2, lab2, margin=margin, loss_type="margin")
    ref2_t = _reference(p1, p2, lab2, margin=margin, loss_type="tanh")
    assert jnp.allclose(loss2_m, ref2_m, rtol=1e-5, atol=1e-5), (loss2_m, ref2_m)
    assert jnp.allclose(loss2_t, ref2_t, rtol=1e-5, atol=1e-5), (loss2_t, ref2_t)

    print("KERNEL_OK")
</pallas_src>

<mosaic_0001>
module attributes {stable_mosaic.version = 11 : i64} {
  func.func @_kernel_dense(%arg0: i32, %arg1: memref<128x32xf32, #tpu.memory_space<vmem>>, %arg2: memref<128x32xf32, #tpu.memory_space<vmem>>, %arg3: memref<1x1x128xf32, #tpu.memory_space<vmem>>, %arg4: memref<1x1x128xf32, #tpu.memory_space<vmem>>) attributes {dimension_semantics = [#tpu.dimension_semantics<parallel>], iteration_bounds = array<i64: 1>, scalar_prefetch = 0 : i64, scratch_operands = 0 : i64, tpu.core_type = #tpu.core_type<tc>, window_params = [{transform_indices = @transform_0, window_bounds = array<i64: 128, 32>}, {transform_indices = @transform_1, window_bounds = array<i64: 128, 32>}, {transform_indices = @transform_2, window_bounds = array<i64: 1, 1, 128>}, {transform_indices = @transform_3, window_bounds = array<i64: 1, 1, 128>}]} {
    %c0 = arith.constant 0 : index
    %c0_0 = arith.constant 0 : index
    %0 = vector.load %arg1[%c0, %c0_0] : memref<128x32xf32, #tpu.memory_space<vmem>>, vector<128x32xf32>
    %c0_1 = arith.constant 0 : index
    %c0_2 = arith.constant 0 : index
    %1 = vector.load %arg2[%c0_1, %c0_2] : memref<128x32xf32, #tpu.memory_space<vmem>>, vector<128x32xf32>
    %2 = arith.subf %0, %1 : vector<128x32xf32>
    %cst = arith.constant 9.99999997E-7 : f32
    %3 = vector.broadcast %cst : f32 to vector<128x32xf32>
    %4 = arith.addf %2, %3 : vector<128x32xf32>
    %5 = arith.mulf %4, %4 : vector<128x32xf32>
    %6 = vector.shape_cast %5 : vector<128x32xf32> to vector<1x128x32xf32>
    %cst_3 = arith.constant dense<0.000000e+00> : vector<1x128xf32>
    %7 = vector.multi_reduction <add>, %6, %cst_3 [2] : vector<1x128x32xf32> to vector<1x128xf32>
    %c0_4 = arith.constant 0 : index
    %c0_5 = arith.constant 0 : index
    %c0_6 = arith.constant 0 : index
    %8 = vector.load %arg3[%c0_4, %c0_5, %c0_6] : memref<1x1x128xf32, #tpu.memory_space<vmem>>, vector<1x1x128xf32>
    %9 = vector.shape_cast %8 : vector<1x1x128xf32> to vector<1x128xf32>
    %10 = math.sqrt %7 : vector<1x128xf32>
    %cst_7 = arith.constant 2.000000e+00 : f32
    %11 = vector.broadcast %cst_7 : f32 to vector<1x128xf32>
    %12 = arith.subf %11, %10 : vector<1x128xf32>
    %cst_8 = arith.constant 0.000000e+00 : f32
    %13 = vector.broadcast %cst_8 : f32 to vector<1x128xf32>
    %14 = arith.maximumf %12, %13 : vector<1x128xf32>
    %15 = arith.mulf %10, %10 : vector<1x128xf32>
    %16 = arith.mulf %9, %15 : vector<1x128xf32>
    %cst_9 = arith.constant 1.000000e+00 : f32
    %17 = vector.broadcast %cst_9 : f32 to vector<1x128xf32>
    %18 = arith.subf %17, %9 : vector<1x128xf32>
    %19 = arith.mulf %14, %14 : vector<1x128xf32>
    %20 = arith.mulf %18, %19 : vector<1x128xf32>
    %21 = arith.addf %16, %20 : vector<1x128xf32>
    %22 = tpu.iota {dimensions = array<i32: 0>} : vector<1x128xi32>
    %23 = tpu.iota {dimensions = array<i32: 1>} : vector<1x128xi32>
    %c128_i32 = arith.constant 128 : i32
    %24 = arith.muli %arg0, %c128_i32 : i32
    %c128_i32_10 = arith.constant 128 : i32
    %25 = vector.broadcast %c128_i32_10 : i32 to vector<1x128xi32>
    %26 = arith.muli %22, %25 : vector<1x128xi32>
    %27 = vector.broadcast %24 : i32 to vector<1x128xi32>
    %28 = arith.addi %27, %26 : vector<1x128xi32>
    %29 = arith.addi %28, %23 : vector<1x128xi32>
    %c10_i32 = arith.constant 10 : i32
    %30 = vector.broadcast %c10_i32 : i32 to vector<1x128xi32>
    %31 = arith.cmpi slt, %29, %30 : vector<1x128xi32>
    %cst_11 = arith.constant 0.000000e+00 : f32
    %32 = vector.broadcast %cst_11 : f32 to vector<1x128xf32>
    %33 = arith.select %31, %21, %32 : vector<1x128xi1>, vector<1x128xf32>
    %c0_12 = arith.constant 0 : index
    %c0_13 = arith.constant 0 : index
    %c0_14 = arith.constant 0 : index
    %34 = vector.load %arg4[%c0_12, %c0_13, %c0_14] : memref<1x1x128xf32, #tpu.memory_space<vmem>>, vector<1x1x128xf32>
    %35 = vector.shape_cast %34 : vector<1x1x128xf32> to vector<1x128xf32>
    %36 = vector.shape_cast %33 : vector<1x128xf32> to vector<1x1x128xf32>
    tpu.vector_store %arg4[%c0_12, %c0_13, %c0_14], %36 {strides = array<i32>} : memref<1x1x128xf32, #tpu.memory_space<vmem>>, vector<1x1x128xf32>,
    return
  }
  func.func @transform_0(%arg0: i32) -> (i32, i32) {
    %c0_i32 = arith.constant 0 : i32
    %c0_i32_0 = arith.constant 0 : i32
    return %arg0, %c0_i32 : i32, i32
  }
  func.func @transform_1(%arg0: i32) -> (i32, i32) {
    %c0_i32 = arith.constant 0 : i32
    %c0_i32_0 = arith.constant 0 : i32
    return %arg0, %c0_i32 : i32, i32
  }
  func.func @transform_2(%arg0: i32) -> (i32, i32, i32) {
    %c0_i32 = arith.constant 0 : i32
    %c0_i32_0 = arith.constant 0 : i32
    %c0_i32_1 = arith.constant 0 : i32
    return %arg0, %c0_i32, %c0_i32_0 : i32, i32, i32
  }
  func.func @transform_3(%arg0: i32) -> (i32, i32, i32) {
    %c0_i32 = arith.constant 0 : i32
    %c0_i32_0 = arith.constant 0 : i32
    %c0_i32_1 = arith.constant 0 : i32
    return %arg0, %c0_i32, %c0_i32_0 : i32, i32, i32
  }
}

module attributes {stable_mosaic.version = 11 : i64} {
  func.func @_kernel_column(%arg0: i32, %arg1: memref<128x32xf32, #tpu.memory_space<vmem>>, %arg2: memref<128x32xf32, #tpu.memory_space<vmem>>, %arg3: memref<128x1xf32, #tpu.memory_space<vmem>>, %arg4: memref<8x128xf32, #tpu.memory_space<vmem>>) attributes {dimension_semantics = [#tpu.dimension_semantics<parallel>], iteration_bounds = array<i64: 1>, scalar_prefetch = 0 : i64, scratch_operands = 0 : i64, tpu.core_type = #tpu.core_type<tc>, window_params = [{transform_indices = @transform_0, window_bounds = array<i64: 128, 32>}, {transform_indices = @transform_1, window_bounds = array<i64: 128, 32>}, {transform_indices = @transform_2, window_bounds = array<i64: 128, 1>}, {transform_indices = @transform_3, window_bounds = array<i64: 8, 128>}]} {
    %c0 = arith.constant 0 : index
    %c0_0 = arith.constant 0 : index
    %0 = vector.load %arg1[%c0, %c0_0] : memref<128x32xf32, #tpu.memory_space<vmem>>, vector<128x32xf32>
    %c0_1 = arith.constant 0 : index
    %c0_2 = arith.constant 0 : index
    %1 = vector.load %arg2[%c0_1, %c0_2] : memref<128x32xf32, #tpu.memory_space<vmem>>, vector<128x32xf32>
    %c0_3 = arith.constant 0 : index
    %c0_4 = arith.constant 0 : index
    %2 = vector.load %arg3[%c0_3, %c0_4] : memref<128x1xf32, #tpu.memory_space<vmem>>, vector<128x1xf32>
    %3 = arith.subf %0, %1 : vector<128x32xf32>
    %cst = arith.constant 9.99999997E-7 : f32
    %4 = vector.broadcast %cst : f32 to vector<128x32xf32>
    %5 = arith.addf %3, %4 : vector<128x32xf32>
    %6 = arith.mulf %5, %5 : vector<128x32xf32>
    %cst_5 = arith.constant dense<0.000000e+00> : vector<128xf32>
    %7 = vector.multi_reduction <add>, %6, %cst_5 [1] : vector<128x32xf32> to vector<128xf32>
    %8 = vector.shape_cast %7 : vector<128xf32> to vector<128x1xf32>
    %9 = math.sqrt %8 : vector<128x1xf32>
    %cst_6 = arith.constant 2.000000e+00 : f32
    %10 = vector.broadcast %cst_6 : f32 to vector<128x1xf32>
    %11 = arith.subf %10, %9 : vector<128x1xf32>
    %cst_7 = arith.constant 0.000000e+00 : f32
    %12 = vector.broadcast %cst_7 : f32 to vector<128x1xf32>
    %13 = arith.maximumf %11, %12 : vector<128x1xf32>
    %14 = arith.mulf %9, %9 : vector<128x1xf32>
    %15 = arith.mulf %2, %14 : vector<128x1xf32>
    %cst_8 = arith.constant 1.000000e+00 : f32
    %16 = vector.broadcast %cst_8 : f32 to vector<128x1xf32>
    %17 = arith.subf %16, %2 : vector<128x1xf32>
    %18 = arith.mulf %13, %13 : vector<128x1xf32>
    %19 = arith.mulf %17, %18 : vector<128x1xf32>
    %20 = arith.addf %15, %19 : vector<128x1xf32>
    %c128_i32 = arith.constant 128 : i32
    %21 = arith.muli %arg0, %c128_i32 : i32
    %22 = tpu.iota {dimensions = array<i32: 0>} : vector<128x1xi32>
    %23 = vector.broadcast %21 : i32 to vector<128x1xi32>
    %24 = arith.addi %23, %22 : vector<128x1xi32>
    %c10_i32 = arith.constant 10 : i32
    %25 = vector.broadcast %c10_i32 : i32 to vector<128x1xi32>
    %26 = arith.cmpi slt, %24, %25 : vector<128x1xi32>
    %cst_9 = arith.constant 0.000000e+00 : f32
    %27 = vector.broadcast %cst_9 : f32 to vector<128x1xf32>
    %28 = arith.select %26, %20, %27 : vector<128x1xi1>, vector<128x1xf32>
    %cst_10 = arith.constant 0.000000e+00 : f32
    %29 = vector.broadcast %cst_10 : f32 to vector<8x128xf32>
    %30 = vector.shape_cast %28 : vector<128x1xf32> to vector<1x128x1xf32>
    %cst_11 = arith.constant dense<0.000000e+00> : vector<1xf32>
    %31 = vector.multi_reduction <add>, %30, %cst_11 [1, 2] : vector<1x128x1xf32> to vector<1xf32>
    %32 = vector.shape_cast %31 : vector<1xf32> to vector<1x1x1xf32>
    %33 = vector.extract %32[0, 0, 0] : f32 from vector<1x1x1xf32>
    %34 = vector.broadcast %33 : f32 to vector<8x128xf32>
    %35 = arith.addf %29, %34 : vector<8x128xf32>
    %c0_12 = arith.constant 0 : index
    %c0_13 = arith.constant 0 : index
    %36 = vector.load %arg4[%c0_12, %c0_13] : memref<8x128xf32, #tpu.memory_space<vmem>>, vector<8x128xf32>
    tpu.vector_store %arg4[%c0_12, %c0_13], %35 {strides = array<i32>} : memref<8x128xf32, #tpu.memory_space<vmem>>, vector<8x128xf32>,
    return
  }
  func.func @transform_0(%arg0: i32) -> (i32, i32) {
    %c0_i32 = arith.constant 0 : i32
    %c0_i32_0 = arith.constant 0 : i32
    return %arg0, %c0_i32 : i32, i32
  }
  func.func @transform_1(%arg0: i32) -> (i32, i32) {
    %c0_i32 = arith.constant 0 : i32
    %c0_i32_0 = arith.constant 0 : i32
    return %arg0, %c0_i32 : i32, i32
  }
  func.func @transform_2(%arg0: i32) -> (i32, i32) {
    %c0_i32 = arith.constant 0 : i32
    %c0_i32_0 = arith.constant 0 : i32
    return %arg0, %c0_i32 : i32, i32
  }
  func.func @transform_3(%arg0: i32) -> (i32, i32) {
    %c0_i32 = arith.constant 0 : i32
    %c0_i32_0 = arith.constant 0 : i32
    return %arg0, %c0_i32 : i32, i32
  }
}

</mosaic_0001>

<bundles_post_ra>
// kernel: tpu_custom_call.1
= control target key start
LH: loop header
LB: loop body
LE: loop exit
PB: predicated region body
PF: predicated region fallthrough
CT: control target
= control target key end

     0   :  { %8 = vsyncpa [#allocation3], 0  ;;  %s4614_s0 = inlined_call_operand.hbm [shape: f32[10,32], index: 0, kind: input, shape index: {}]   ;;  %s4615_s1 = inlined_call_operand.hbm [shape: f32[10,32], index: 1, kind: input, shape index: {}]   ;;  %s4616_s2 = inlined_call_operand.vmem [shape: f32[1,1,128], index: 2, kind: input, shape index: {}]   ;;  %s4617_s3 = inlined_call_operand.hbm [shape: f32[1,1,128], index: 3, kind: output, shape index: {}]  }
   0x1   :  { %9 = vsyncpa [#allocation6], 0 }
   0x2   :  { %10 = vsyncpa [#allocation4], 0 }
   0x3   :  { %15 = vsyncadd [#allocation3], 1792  ;;  %s3432_s12 = smov [#allocation2]   ;;  %s3360_s16 = scalar_lea.hbm %s4614_s0, 256 }
   0x4   :  { %s16_s13 = sshll.u32 %s3432_s12, 4  ;;  %p3361_p0 = scmp.ne.s32.totalorder %s4614_s0, %s3360_s16  ;;  %s17_s13 = int_to_ptr.vmem [resolvable:$true] %s16_s13 }
   0x5   :  { %p3364_p1 = scmp.lt.u32.totalorder %s3360_s16, %s4614_s0 }
   0x7   :  { %p3366_p2 = pnand %p3364_p1, %p3361_p0 }
   0x9   :  { %3369 = shalt.err (!%p3366_p2)
}
   0xa   :  { %s3370_s21 = scalar_lea.vmem %s17_s13, 256  ;;  %s3374_s22 = scalar_lea.vmem %s17_s13, 2048 }
   0xb   :  { %p3371_p3 = scmp.ne.s32.totalorder %s17_s13, %s3370_s21  ;;  %p3375_p4 = scmp.lt.s32.totalorder %s17_s13, %s17_s13 }
   0xc   :  { %p3376_p5 = scmp.lt.s32.totalorder %s3374_s22, %s3370_s21 }
   0xe   :  { %p3377_p6 = por %p3376_p5, %p3375_p4 }
  0x10   :  { %p3378_p7 = pnand %p3377_p6, %p3371_p3 }
  0x12   :  { %3381 = shalt.err (!%p3378_p7)
}
  0x13   :  { %s3433_s23 = smov 128   ;;  %s3434_s24 = smov 8  }
  0x14   :  { %22 = dma.hbm_to_vmem [thread:$0]  %s4614_s0, 256, %s17_s13, [#allocation3], %s3433_s23, %s3433_s23, %s3434_s24  }
  0x15   :  { %27 = vsyncadd [#allocation6], 1792  ;;  %s3435_s27 = smov [#allocation5]   ;;  %s3382_s4 = scalar_lea.hbm %s4615_s1, 256 }
  0x16   :  { %s28_s28 = sshll.u32 %s3435_s27, 4  ;;  %p3383_p8 = scmp.ne.s32.totalorder %s4615_s1, %s3382_s4  ;;  %s29_s28 = int_to_ptr.vmem [resolvable:$true] %s28_s28 }
  0x17   :  { %p3386_p9 = scmp.lt.u32.totalorder %s3382_s4, %s4615_s1 }
  0x19   :  { %p3388_p10 = pnand %p3386_p9, %p3383_p8 }
  0x1b   :  { %3391 = shalt.err (!%p3388_p10)
}
  0x1c   :  { %s3392_s9 = scalar_lea.vmem %s29_s28, 256  ;;  %s3396_s0 = scalar_lea.vmem %s29_s28, 2048 }
  0x1d   :  { %p3393_p11 = scmp.ne.s32.totalorder %s29_s28, %s3392_s9  ;;  %p3397_p12 = scmp.lt.s32.totalorder %s29_s28, %s29_s28 }
  0x1e   :  { %p3398_p13 = scmp.lt.s32.totalorder %s3396_s0, %s3392_s9 }
  0x20   :  { %p3399_p0 = por %p3398_p13, %p3397_p12 }
  0x22   :  { %p3400_p1 = pnand %p3399_p0, %p3393_p11 }
  0x24   :  { %3403 = shalt.err (!%p3400_p1)
}
  0x25   :  { %34 = dma.hbm_to_vmem [thread:$0]  %s4615_s1, 256, %s29_s28, [#allocation6], %s3433_s23, %s3433_s23, %s3434_s24  }
  0x26   :  { %3426 = dma.done.wait [#allocation3], 2048  }
  0x27   :  { %3427 = vsyncadd [#allocation3], 4294965248 }
  0x28   :  { %3428 = dma.done.wait [#allocation6], 2048  }
  0x29   :  { %3429 = vsyncadd [#allocation6], 4294965248  ;;  %v45_v0 = vld [vmem:[#allocation2 + $0x10] sm:$0xff]  ;;  %v43_v2 = vld [vmem:[#allocation2] sm:$0xff]  ;;  %vm123_vm0 = vcmask 261120  }
  0x2a   :  { %v61_v1 = vld [vmem:[#allocation5 + $0x10] sm:$0xff]  ;;  %v59_v4 = vld [vmem:[#allocation5] sm:$0xff]  ;;  %v46_v5 = vld [vmem:[#allocation2 + $0x18] sm:$0xff] }
  0x2b   :  { %v77_v3 = vsub.f32 %v45_v0, %v61_v1  ;;  %v62_v6 = vld [vmem:[#allocation5 + $0x18] sm:$0xff]  ;;  %v75_v7 = vsub.f32 %v43_v2, %v59_v4  ;;  %v44_v9 = vld [vmem:[#allocation2 + $0x8] sm:$0xff]  ;;  %v47_v15 = vld [vmem:[#allocation2 + $0x20] sm:$0xff] }
  0x2c   :  { %v78_v8 = vsub.f32 %v46_v5, %v62_v6  ;;  %v60_v10 = vld [vmem:[#allocation5 + $0x8] sm:$0xff]  ;;  %v63_v16 = vld [vmem:[#allocation5 + $0x20] sm:$0xff]  ;;  %v49_v21 = vld [vmem:[#allocation2 + $0x30] sm:$0xff] }
  0x2d   :  { %v48_v11 = vld [vmem:[#allocation2 + $0x28] sm:$0xff]  ;;  %v93_v12 = vadd.f32 1e-06, %v77_v3  ;;  %v76_v13 = vsub.f32 %v44_v9, %v60_v10  ;;  %v91_v17 = vadd.f32 1e-06, %v75_v7  ;;  %v79_v20 = vsub.f32 %v47_v15, %v63_v16  ;;  %v65_v22 = vld [vmem:[#allocation5 + $0x30] sm:$0xff] }
  0x2e   :  { %v64_v14 = vld [vmem:[#allocation5 + $0x28] sm:$0xff]  ;;  %v94_v18 = vadd.f32 1e-06, %v78_v8  ;;  %v81_v25 = vsub.f32 %v49_v21, %v65_v22  ;;  %v50_v26 = vld [vmem:[#allocation2 + $0x38] sm:$0xff]  ;;  %v51_v32 = vld [vmem:[#allocation2 + $0x40] sm:$0xff] }
  0x2f   :  { %v80_v19 = vsub.f32 %v48_v11, %v64_v14  ;;  %v109_v23 = vmul.f32 %v93_v12, %v93_v12  ;;  %v92_v24 = vadd.f32 1e-06, %v76_v13  ;;  %v66_v27 = vld [vmem:[#allocation5 + $0x38] sm:$0xff]  ;;  %v107_v28 = vmul.f32 %v91_v17, %v91_v17  ;;  %v67_v36 = vld [vmem:[#allocation5 + $0x40] sm:$0xff]  ;;  %v52_v37 = vld [vmem:[#allocation2 + $0x48] sm:$0xff] }
  0x30   :  { %v110_v29 = vmul.f32 %v94_v18, %v94_v18  ;;  %v95_v31 = vadd.f32 1e-06, %v79_v20  ;;  %v82_v35 = vsub.f32 %v50_v26, %v66_v27  ;;  %v68_v38 = vld [vmem:[#allocation5 + $0x48] sm:$0xff]  ;;  %v97_v42 = vadd.f32 1e-06, %v81_v25  ;;  %v54_v48 = vld [vmem:[#allocation2 + $0x58] sm:$0xff] }
  0x31   :  { %v96_v30 = vadd.f32 1e-06, %v80_v19  ;;  %v130_v33 = vsel %vm123_vm0, %v109_v23, 0.0  ;;  %v108_v34 = vmul.f32 %v92_v24, %v92_v24  ;;  %v124_v39 = vsel %vm123_vm0, %v107_v28, 0.0  ;;  %v70_v49 = vld [vmem:[#allocation5 + $0x58] sm:$0xff]  ;;  %v53_v50 = vld [vmem:[#allocation2 + $0x50] sm:$0xff] }
  0x32   :  { %131 = vadd.xlane.f32.xlu1 %v130_v33  ;;  %125 = vadd.xlane.f32.xlu0 %v124_v39  ;;  %v133_v40 = vsel %vm123_vm0, %v110_v29, 0.0  ;;  %v98_v43 = vadd.f32 1e-06, %v82_v35  ;;  %v111_v45 = vmul.f32 %v95_v31, %v95_v31  ;;  %v83_v46 = vsub.f32 %v51_v32, %v67_v36  ;;  %v69_v51 = vld [vmem:[#allocation5 + $0x50] sm:$0xff]  ;;  %v56_v60 = vld [vmem:[#allocation2 + $0x68] sm:$0xff]  ;;  %v55_v62 = vld [vmem:[#allocation2 + $0x60] sm:$0xff] }
  0x33   :  { %v112_v41 = vmul.f32 %v96_v30, %v96_v30  ;;  %v127_v44 = vsel %vm123_vm0, %v108_v34, 0.0  ;;  %v84_v47 = vsub.f32 %v52_v37, %v68_v38  ;;  %v86_v55 = vsub.f32 %v54_v48, %v70_v49  ;;  %v72_v61 = vld [vmem:[#allocation5 + $0x68] sm:$0xff]  ;;  %v71_v63 = vld [vmem:[#allocation5 + $0x60] sm:$0xff]  ;;  %v58_v8 = vld [vmem:[#allocation2 + $0x78] sm:$0xff] }
  0x34   :  { %v114_v53 = vmul.f32 %v98_v43, %v98_v43  ;;  %v136_v56 = vsel %vm123_vm0, %v111_v45, 0.0  ;;  %v113_v57 = vmul.f32 %v97_v42, %v97_v42  ;;  %v99_v58 = vadd.f32 1e-06, %v83_v46  ;;  %v74_v9 = vld [vmem:[#allocation5 + $0x78] sm:$0xff]  ;;  %v57_v10 = vld [vmem:[#allocation2 + $0x70] sm:$0xff] }
  0x35   :  { %v139_v52 = vsel %vm123_vm0, %v112_v41, 0.0  ;;  %v100_v54 = vadd.f32 1e-06, %v84_v47  ;;  %v85_v59 = vsub.f32 %v53_v50, %v69_v51  ;;  %v102_v2 = vadd.f32 1e-06, %v86_v55  ;;  %v73_v11 = vld [vmem:[#allocation5 + $0x70] sm:$0xff] }
  0x36   :  { %134 = vadd.xlane.f32.xlu1 %v133_v40  ;;  %128 = vadd.xlane.f32.xlu0 %v127_v44  ;;  %v145_v0 = vsel %vm123_vm0, %v114_v53, 0.0  ;;  %v88_v3 = vsub.f32 %v56_v60, %v72_v61  ;;  %v142_v4 = vsel %vm123_vm0, %v113_v57, 0.0  ;;  %v115_v5 = vmul.f32 %v99_v58, %v99_v58 }
  0x37   :  { %v116_v1 = vmul.f32 %v100_v54, %v100_v54  ;;  %v101_v6 = vadd.f32 1e-06, %v85_v59  ;;  %v87_v7 = vsub.f32 %v55_v62, %v71_v63  ;;  %v118_v13 = vmul.f32 %v102_v2, %v102_v2 }
  0x38   :  { %v104_v14 = vadd.f32 1e-06, %v88_v3  ;;  %v90_v15 = vsub.f32 %v58_v8, %v74_v9  ;;  %v148_v16 = vsel %vm123_vm0, %v115_v5, 0.0  ;;  %v89_v19 = vsub.f32 %v57_v10, %v73_v11 }
  0x39   :  { %v151_v12 = vsel %vm123_vm0, %v116_v1, 0.0  ;;  %v117_v17 = vmul.f32 %v101_v6, %v101_v6  ;;  %v103_v18 = vadd.f32 1e-06, %v87_v7  ;;  %v157_v20 = vsel %vm123_vm0, %v118_v13, 0.0 }
  0x3a   :  { %140 = vadd.xlane.f32.xlu1 %v139_v52  ;;  %137 = vadd.xlane.f32.xlu0 %v136_v56  ;;  %v120_v21 = vmul.f32 %v104_v14, %v104_v14  ;;  %v106_v22 = vadd.f32 1e-06, %v90_v15  ;;  %v105_v25 = vadd.f32 1e-06, %v89_v19  ;;  %v3436_v32 = vmov 0  }
  0x3b   :  { %v154_v23 = vsel %vm123_vm0, %v117_v17, 0.0  ;;  %v119_v24 = vmul.f32 %v103_v18, %v103_v18  ;;  %3326 = vset.pattern.permute.xlu0 %v3436_v32  ;;  %3327 = vset.pattern.permute.xlu1 %v3436_v32  ;;  %v349_v33 = vlaneseq  ;;  %v3437_v36 = vmov 1966171168  }
  0x3c   :  { %v163_v26 = vsel %vm123_vm0, %v120_v21, 0.0  ;;  %v122_v27 = vmul.f32 %v106_v22, %v106_v22  ;;  %v121_v29 = vmul.f32 %v105_v25, %v105_v25  ;;  %v866_v37 = vunpack.c.l.s4 %v3437_v36 }
  0x3d   :  { %v160_v28 = vsel %vm123_vm0, %v119_v24, 0.0  ;;  %v3500_v38 = vshrl.u32 %v349_v33, 7 }
  0x3e   :  { %146 = vadd.xlane.f32.xlu1 %v145_v0  ;;  %143 = vadd.xlane.f32.xlu0 %v142_v4  ;;  %v169_v30 = vsel %vm123_vm0, %v122_v27, 0.0  ;;  %v166_v31 = vsel %vm123_vm0, %v121_v29, 0.0  ;;  %v867_v41 = vunpack.c.0.s8 %v866_v37 }
  0x3f   :  { %v3509_v42 = vsub.s32 0, %v3500_v38  ;;  %v3512_v43 = vsub.s32 1, %v3500_v38  ;;  %v3515_v44 = vsub.s32 2, %v3500_v38  ;;  %v3520_v46 = vsub.s32 3, %v3500_v38 }
  0x40   :  { %v3523_v47 = vsub.s32 4, %v3500_v38  ;;  %v3526_v48 = vsub.s32 5, %v3500_v38  ;;  %v3529_v49 = vsub.s32 6, %v3500_v38  ;;  %v3535_v51 = vsub.s32 7, %v3500_v38 }
  0x41   :  { %v3538_v52 = vsub.s32 %v867_v41, %v3500_v38 }
  0x42   :  { %152 = vadd.xlane.f32.xlu1 %v151_v12  ;;  %149 = vadd.xlane.f32.xlu0 %v148_v16 }
  0x46   :  { %158 = vadd.xlane.f32.xlu1 %v157_v20  ;;  %155 = vadd.xlane.f32.xlu0 %v154_v23 }
  0x4a   :  { %164 = vadd.xlane.f32.xlu1 %v163_v26  ;;  %161 = vadd.xlane.f32.xlu0 %v160_v28 }
  0x4e   :  { %170 = vadd.xlane.f32.xlu1 %v169_v30  ;;  %167 = vadd.xlane.f32.xlu0 %v166_v31 }
  0xbf   :  { %v132_v34 = vpop.xlane.xlu1 %131  ;;  %v126_v35 = vpop.xlane.xlu0 %125 }
  0xc0   :  { %3328 = vrsqrt.f32 %v132_v34  ;;  %vm189_vm1 = vcmp.eq.f32.partialorder %v132_v34, inf  ;;  %vm191_vm2 = vcmp.eq.f32.partialorder %v132_v34, 0.0  ;;  %v192_v53 = vand.u32 2147483648, %v132_v34 }
  0xc1   :  { %3330 = vrsqrt.f32 %v126_v35  ;;  %vm175_vm3 = vcmp.eq.f32.partialorder %v126_v35, inf  ;;  %vm177_vm4 = vcmp.eq.f32.partialorder %v126_v35, 0.0  ;;  %v178_v55 = vand.u32 2147483648, %v126_v35 }
  0xc3   :  { %v3502_v39 = vpop.xlane.xlu1 %134  ;;  %v3505_v40 = vpop.xlane.xlu0 %128 }
  0xc4   :  { %3332 = vrsqrt.f32 %v3502_v39  ;;  %vm196_vm5 = vcmp.eq.f32.partialorder %v3502_v39, inf  ;;  %vm198_vm6 = vcmp.eq.f32.partialorder %v3502_v39, 0.0  ;;  %v199_v58 = vand.u32 2147483648, %v3502_v39 }
  0xc5   :  { %3334 = vrsqrt.f32 %v3505_v40  ;;  %vm182_vm7 = vcmp.eq.f32.partialorder %v3505_v40, inf  ;;  %vm184_vm8 = vcmp.eq.f32.partialorder %v3505_v40, 0.0  ;;  %v185_v61 = vand.u32 2147483648, %v3505_v40 }
  0xc7   :  { %v3517_v45 = vpop.xlane.xlu1 %140  ;;  %v3532_v50 = vpop.xlane.xlu0 %137 }
  0xc8   :  { %3336 = vrsqrt.f32 %v3517_v45  ;;  %vm210_vm9 = vcmp.eq.f32.partialorder %v3517_v45, inf  ;;  %vm212_vm10 = vcmp.eq.f32.partialorder %v3517_v45, 0.0  ;;  %v213_v0 = vand.u32 2147483648, %v3517_v45 }
  0xc9   :  { %3338 = vrsqrt.f32 %v3532_v50  ;;  %vm203_vm11 = vcmp.eq.f32.partialorder %v3532_v50, inf  ;;  %v206_v4 = vand.u32 2147483648, %v3532_v50  ;;  %vm205_vm13 = vcmp.eq.f32.partialorder %v3532_v50, 0.0 }
  0xca   :  { %v3329_v54 = vpop.eup %3328 }
  0xcb   :  { %v3331_v56 = vpop.eup %3330  ;;  %v188_v57 = vmul.f32 %v3329_v54, %v132_v34  ;;  %v3546_v59 = vpop.xlane.xlu1 %146 }
  0xcc   :  { %v174_v60 = vmul.f32 %v3331_v56, %v126_v35  ;;  %v3550_v62 = vpop.xlane.xlu0 %143  ;;  %3340 = vrsqrt.f32 %v3546_v59  ;;  %vm224_vm12 = vcmp.eq.f32.partialorder %v3546_v59, inf  ;;  %vm226_vm14 = vcmp.eq.f32.partialorder %v3546_v59, 0.0 }
  0xcd   :  { %v190_v63 = vsel %vm189_vm1, %v132_v34, %v188_v57  ;;  %3342 = vrsqrt.f32 %v3550_v62  ;;  %vm217_vm15 = vcmp.eq.f32.partialorder %v3550_v62, inf  ;;  %vm219_vm0 = vcmp.eq.f32.partialorder %v3550_v62, 0.0 }
  0xce   :  { %v3333_v1 = vpop.eup %3332  ;;  %v193_v2 = vsel %vm191_vm2, %v192_v53, %v190_v63  ;;  %v176_v3 = vsel %vm175_vm3, %v126_v35, %v174_v60  ;;  %v220_v15 = vand.u32 2147483648, %v3550_v62  ;;  %v227_v20 = vand.u32 2147483648, %v3546_v59 }
  0xcf   :  { %v3335_v5 = vpop.eup %3334  ;;  %v287_v6 = vsub.f32 2.0, %v193_v2  ;;  %v179_v7 = vsel %vm177_vm4, %v178_v55, %v176_v3  ;;  %v195_v8 = vmul.f32 %v3333_v1, %v3502_v39  ;;  %v3566_v9 = vpop.xlane.xlu1 %152  ;;  %v3585_v22 = vmul.f32 %v193_v2, %v193_v2 }
  0xd0   :  { %v285_v10 = vsub.f32 2.0, %v179_v7  ;;  %v181_v11 = vmul.f32 %v3335_v5, %v3505_v40  ;;  %v3570_v12 = vpop.xlane.xlu0 %149  ;;  %3344 = vrsqrt.f32 %v3566_v9  ;;  %v3587_v23 = vmul.f32 %v179_v7, %v179_v7 }
  0xd1   :  { %v303_v13 = vmax.f32 %v287_v6, 0.0  ;;  %v197_v14 = vsel %vm196_vm5, %v3502_v39, %v195_v8  ;;  %3346 = vrsqrt.f32 %v3570_v12  ;;  %vm231_vm1 = vcmp.eq.f32.partialorder %v3570_v12, inf }
  0xd2   :  { %v3337_v16 = vpop.eup %3336  ;;  %v301_v17 = vmax.f32 %v285_v10, 0.0  ;;  %v200_v18 = vsel %vm198_vm6, %v199_v58, %v197_v14  ;;  %v183_v19 = vsel %vm182_vm7, %v3505_v40, %v181_v11  ;;  %vm233_vm2 = vcmp.eq.f32.partialorder %v3570_v12, 0.0 }
  0xd3   :  { %v3339_v21 = vpop.eup %3338  ;;  %v288_v24 = vsub.f32 2.0, %v200_v18  ;;  %v186_v25 = vsel %vm184_vm8, %v185_v61, %v183_v19  ;;  %v209_v27 = vmul.f32 %v3337_v16, %v3517_v45  ;;  %v3594_v28 = vmul.f32 %v303_v13, %v303_v13 }
  0xd4   :  { %v286_v26 = vsub.f32 2.0, %v186_v25  ;;  %v3596_v29 = vmul.f32 %v301_v17, %v301_v17  ;;  %v3598_v30 = vmul.f32 %v200_v18, %v200_v18  ;;  %v202_v31 = vmul.f32 %v3339_v21, %v3532_v50  ;;  %v3613_v55 = vpop.xlane.xlu0 %155 }
  0xd5   :  { %v304_v34 = vmax.f32 %v288_v24, 0.0  ;;  %v3601_v35 = vmul.f32 %v186_v25, %v186_v25  ;;  %v211_v36 = vsel %vm210_vm9, %v3517_v45, %v209_v27  ;;  %v234_v37 = vand.u32 2147483648, %v3570_v12 }
  0xd6   :  { %v3341_v32 = vpop.eup %3340  ;;  %v302_v40 = vmax.f32 %v286_v26, 0.0  ;;  %v214_v41 = vsel %vm212_vm10, %v213_v0, %v211_v36  ;;  %v204_v53 = vsel %vm203_vm11, %v3532_v50, %v202_v31  ;;  %vm238_vm3 = vcmp.eq.f32.partialorder %v3566_v9, inf }
  0xd7   :  { %v3343_v39 = vpop.eup %3342  ;;  %v223_v54 = vmul.f32 %v3341_v32, %v3546_v59  ;;  %v290_v56 = vsub.f32 2.0, %v214_v41  ;;  %v207_v57 = vsel %vm205_vm13, %v206_v4, %v204_v53  ;;  %vm240_vm4 = vcmp.eq.f32.partialorder %v3566_v9, 0.0 }
  0xd8   :  { %v289_v58 = vsub.f32 2.0, %v207_v57  ;;  %v216_v45 = vmul.f32 %v3343_v39, %v3550_v62  ;;  %v241_v61 = vand.u32 2147483648, %v3566_v9  ;;  %v3624_v0 = vmul.f32 %v304_v34, %v304_v34 }
  0xd9   :  { %v225_v60 = vsel %vm224_vm12, %v3546_v59, %v223_v54  ;;  %v306_v1 = vmax.f32 %v290_v56, 0.0  ;;  %3348 = vrsqrt.f32 %v3613_v55  ;;  %v3629_v3 = vmul.f32 %v302_v40, %v302_v40  ;;  %v3685_v54 = vpop.xlane.xlu0 %161 }
  0xda   :  { %v3345_v63 = vpop.eup %3344  ;;  %v228_v50 = vsel %vm226_vm14, %v227_v20, %v225_v60  ;;  %v305_v4 = vmax.f32 %v289_v58, 0.0  ;;  %v218_v5 = vsel %vm217_vm15, %v3550_v62, %v216_v45  ;;  %v3634_v7 = vmul.f32 %v214_v41, %v214_v41 }
  0xdb   :  { %v3347_v2 = vpop.eup %3346  ;;  %v292_v6 = vsub.f32 2.0, %v228_v50  ;;  %v221_v8 = vsel %vm219_vm0, %v220_v15, %v218_v5  ;;  %v237_v59 = vmul.f32 %v3345_v63, %v3566_v9  ;;  %v3640_v11 = vmul.f32 %v207_v57, %v207_v57  ;;  %v3653_v15 = vpop.xlane.xlu1 %158 }
  0xdc   :  { %v230_v10 = vmul.f32 %v3347_v2, %v3570_v12  ;;  %v291_v13 = vsub.f32 2.0, %v221_v8  ;;  %vm245_vm5 = vcmp.eq.f32.partialorder %v3613_v55, inf  ;;  %v3643_v16 = vmul.f32 %v306_v1, %v306_v1 }
  0xdd   :  { %v308_v14 = vmax.f32 %v292_v6, 0.0  ;;  %v3645_v17 = vmul.f32 %v228_v50, %v228_v50  ;;  %v239_v62 = vsel %vm238_vm3, %v3566_v9, %v237_v59  ;;  %v3655_v19 = vmul.f32 %v305_v4, %v305_v4 }
  0xde   :  { %v232_v18 = vsel %vm231_vm1, %v3570_v12, %v230_v10  ;;  %v307_v20 = vmax.f32 %v291_v13, 0.0  ;;  %v242_v24 = vsel %vm240_vm4, %v241_v61, %v239_v62  ;;  %v3661_v25 = vmul.f32 %v221_v8, %v221_v8 }
  0xdf   :  { %v235_v21 = vsel %vm233_vm2, %v234_v37, %v232_v18  ;;  %v294_v27 = vsub.f32 2.0, %v242_v24  ;;  %vm247_vm6 = vcmp.eq.f32.partialorder %v3613_v55, 0.0  ;;  %v3664_v31 = vmul.f32 %v308_v14, %v308_v14 }
  0xe0   :  { %v293_v26 = vsub.f32 2.0, %v235_v21  ;;  %v3666_v32 = vmul.f32 %v235_v21, %v235_v21  ;;  %v248_v34 = vand.u32 2147483648, %v3613_v55  ;;  %3350 = vrsqrt.f32 %v3653_v15 }
  0xe1   :  { %v3670_v36 = vmul.f32 %v307_v20, %v307_v20  ;;  %v3672_v37 = vmul.f32 %v242_v24, %v242_v24  ;;  %v352_v9 = vrot.slane %v3587_v23, %v3509_v42  ;;  %vm252_vm7 = vcmp.eq.f32.partialorder %v3653_v15, inf }
  0xe2   :  { %v309_v12 = vmax.f32 %v293_v26, 0.0  ;;  %v356_v39 = vrot.slane %v3587_v23, %v3512_v43  ;;  %v360_v40 = vrot.slane %v3587_v23, %v3515_v44  ;;  %v364_v41 = vrot.slane %v3587_v23, %v3520_v46 }
  0xe3   :  { %v368_v53 = vrot.slane %v3587_v23, %v3523_v47  ;;  %v3349_v56 = vpop.eup %3348  ;;  %v310_v57 = vmax.f32 %v294_v27, 0.0  ;;  %vm254_vm8 = vcmp.eq.f32.partialorder %v3653_v15, 0.0  ;;  %v372_v58 = vrot.slane %v3587_v23, %v3526_v48 }
  0xe4   :  { %v376_v45 = vrot.slane %v3587_v23, %v3529_v49  ;;  %v244_v60 = vmul.f32 %v3349_v56, %v3613_v55  ;;  %v380_v61 = vrot.slane %v3587_v23, %v3535_v51  ;;  %v861_v63 = vcombine.low %v352_v9, %v356_v39 }
  0xe5   :  { %v862_v1 = vcombine.low %v360_v40, %v364_v41  ;;  %v3695_v50 = vmul.f32 %v309_v12, %v309_v12  ;;  %v255_v2 = vand.u32 2147483648, %v3653_v15  ;;  %v863_v4 = vcombine.low %v368_v53, %v372_v58 }
  0xe6   :  { %3352 = vrsqrt.f32 %v3685_v54  ;;  %v246_v5 = vsel %vm245_vm5, %v3613_v55, %v244_v60  ;;  %v864_v6 = vcombine.low %v376_v45, %v380_v61  ;;  %v871_v8 = vrot.slane %v861_v63, %v3538_v52 }
  0xe7   :  { %v878_v10 = vrot.slane %v862_v1, %v3538_v52  ;;  %v3704_v59 = vmul.f32 %v310_v57, %v310_v57  ;;  %v249_v23 = vsel %vm247_vm6, %v248_v34, %v246_v5  ;;  %v885_v13 = vrot.slane %v863_v4, %v3538_v52 }
  0xe8   :  { %v1856_v14 = vrot.slane %v3596_v29, %v3509_v42  ;;  %v295_v18 = vsub.f32 2.0, %v249_v23  ;;  %v892_v62 = vrot.slane %v864_v6, %v3538_v52  ;;  %vm259_vm9 = vcmp.eq.f32.partialorder %v3685_v54, inf }
  0xe9   :  { %v893_v20 = vcombine.low %v871_v8, %v878_v10  ;;  %v1860_v21 = vrot.slane %v3596_v29, %v3512_v43  ;;  %v1864_v24 = vrot.slane %v3596_v29, %v3515_v44  ;;  %v1868_v55 = vrot.slane %v3596_v29, %v3520_v46 }
  0xea   :  { %v1872_v26 = vrot.slane %v3596_v29, %v3523_v47  ;;  %v3351_v27 = vpop.eup %3350  ;;  %v894_v34 = vcombine.low %v885_v13, %v892_v62  ;;  %vm261_vm10 = vcmp.eq.f32.partialorder %v3685_v54, 0.0  ;;  %v1876_v9 = vrot.slane %v3596_v29, %v3526_v48 }
  0xeb   :  { %v901_v12 = vrot.slane %v893_v20, %v3538_v52  ;;  %v251_v39 = vmul.f32 %v3351_v27, %v3653_v15  ;;  %v1880_v40 = vrot.slane %v3596_v29, %v3529_v49  ;;  %v1884_v41 = vrot.slane %v3596_v29, %v3535_v51 }
  0xec   :  { %v2365_v53 = vcombine.low %v1856_v14, %v1860_v21  ;;  %v908_v56 = vrot.slane %v894_v34, %v3538_v52  ;;  %v262_v57 = vand.u32 2147483648, %v3685_v54  ;;  %v2366_v58 = vcombine.low %v1864_v24, %v1868_v55 }
  0xed   :  { %v2367_v45 = vcombine.low %v1872_v26, %v1876_v9  ;;  %v311_v60 = vmax.f32 %v295_v18, 0.0  ;;  %v253_v61 = vsel %vm252_vm7, %v3653_v15, %v251_v39  ;;  %v2368_v63 = vcombine.low %v1880_v40, %v1884_v41  ;;  %v3762_v39 = vpop.xlane.xlu1 %164 }
  0xee   :  { %v2375_v1 = vrot.slane %v2365_v53, %v3538_v52  ;;  %v256_v4 = vsel %vm254_vm8, %v255_v2, %v253_v61  ;;  %v909_v5 = vcombine.low %v901_v12, %v908_v56  ;;  %v2382_v29 = vrot.slane %v2366_v58, %v3538_v52 }
  0xef   :  { %v2389_v6 = vrot.slane %v2367_v45, %v3538_v52  ;;  %v296_v10 = vsub.f32 2.0, %v256_v4  ;;  %v2396_v13 = vrot.slane %v2368_v63, %v3538_v52  ;;  %v384_v14 = vrot.slane %v3601_v35, %v3509_v42 }
  0xf0   :  { %v3353_v8 = vpop.eup %3352  ;;  %v388_v18 = vrot.slane %v3601_v35, %v3512_v43  ;;  %1646 = vperm.xlu0 %3326, %v909_v5   ;;  %v2397_v15 = vcombine.low %v2375_v1, %v2382_v29  ;;  %v392_v2 = vrot.slane %v3601_v35, %v3515_v44  ;;  %v396_v20 = vrot.slane %v3601_v35, %v3520_v46 }
  0xf1   :  { %v258_v62 = vmul.f32 %v3353_v8, %v3685_v54  ;;  %v312_v21 = vmax.f32 %v296_v10, 0.0  ;;  %v2398_v24 = vcombine.low %v2389_v6, %v2396_v13  ;;  %v400_v55 = vrot.slane %v3601_v35, %v3523_v47 }
  0xf2   :  { %v404_v26 = vrot.slane %v3601_v35, %v3526_v48  ;;  %v2405_v34 = vrot.slane %v2397_v15, %v3538_v52  ;;  %v408_v12 = vrot.slane %v3601_v35, %v3529_v49  ;;  %v412_v9 = vrot.slane %v3601_v35, %v3535_v51 }
  0xf3   :  { %v260_v27 = vsel %vm259_vm9, %v3685_v54, %v258_v62  ;;  %v3764_v40 = vmul.f32 %v249_v23, %v249_v23  ;;  %v2412_v53 = vrot.slane %v2398_v24, %v3538_v52  ;;  %v910_v56 = vcombine.low %v384_v14, %v388_v18 }
  0xf4   :  { %v3768_v41 = vsel %vm261_vm10, %v262_v57, %v260_v27  ;;  %v3771_v58 = vmul.f32 %v311_v60, %v311_v60  ;;  %v911_v61 = vcombine.low %v392_v2, %v396_v20  ;;  %v912_v63 = vcombine.low %v400_v55, %v404_v26 }
  0xf5   :  { %v297_v45 = vsub.f32 2.0, %v3768_v41  ;;  %v2413_v1 = vcombine.low %v2405_v34, %v2412_v53  ;;  %v913_v5 = vcombine.low %v408_v12, %v412_v9  ;;  %v920_v35 = vrot.slane %v910_v56, %v3538_v52 }
  0xf6   :  { %3354 = vrsqrt.f32 %v3762_v39  ;;  %v3776_v23 = vmul.f32 %v256_v4, %v256_v4  ;;  %v3778_v54 = vmul.f32 %v312_v21, %v312_v21  ;;  %v927_v57 = vrot.slane %v911_v61, %v3538_v52 }
  0xf7   :  { %v934_v29 = vrot.slane %v912_v63, %v3538_v52  ;;  %v313_v60 = vmax.f32 %v297_v45, 0.0  ;;  %3150 = vperm.xlu0 %3326, %v2413_v1   ;;  %v941_v6 = vrot.slane %v913_v5, %v3538_v52  ;;  %vm266_vm11 = vcmp.eq.f32.partialorder %v3762_v39, inf  ;;  %v3815_v5 = vpop.xlane.xlu0 %167 }
  0xf8   :  { %v1920_v8 = vrot.slane %v3594_v28, %v3509_v42  ;;  %v942_v10 = vcombine.low %v920_v35, %v927_v57  ;;  %vm268_vm12 = vcmp.eq.f32.partialorder %v3762_v39, 0.0  ;;  %v269_v4 = vand.u32 2147483648, %v3762_v39 }
  0xf9   :  { %v1924_v13 = vrot.slane %v3594_v28, %v3512_v43  ;;  %v1928_v14 = vrot.slane %v3594_v28, %v3515_v44  ;;  %v943_v18 = vcombine.low %v934_v29, %v941_v6  ;;  %v1932_v62 = vrot.slane %v3594_v28, %v3520_v46 }
  0xfa   :  { %v1936_v15 = vrot.slane %v3594_v28, %v3523_v47  ;;  %v1940_v2 = vrot.slane %v3594_v28, %v3526_v48  ;;  %v950_v20 = vrot.slane %v942_v10, %v3538_v52  ;;  %v1944_v21 = vrot.slane %v3594_v28, %v3529_v49 }
  0xfb   :  { %v1948_v24 = vrot.slane %v3594_v28, %v3535_v51  ;;  %v2463_v55 = vcombine.low %v1920_v8, %v1924_v13  ;;  %v957_v26 = vrot.slane %v943_v18, %v3538_v52  ;;  %v2464_v27 = vcombine.low %v1928_v14, %v1932_v62 }
  0xfc   :  { %v2465_v34 = vcombine.low %v1936_v15, %v1940_v2  ;;  %v416_v12 = vrot.slane %v3585_v22, %v3509_v42  ;;  %v420_v56 = vrot.slane %v3585_v22, %v3512_v43  ;;  %v424_v45 = vrot.slane %v3585_v22, %v3515_v44 }
  0xfd   :  { %v2466_v9 = vcombine.low %v1944_v21, %v1948_v24  ;;  %v2473_v53 = vrot.slane %v2463_v55, %v3538_v52  ;;  %v958_v61 = vcombine.low %v950_v20, %v957_v26  ;;  %v2480_v28 = vrot.slane %v2464_v27, %v3538_v52 }
  0xfe   :  { %v2487_v63 = vrot.slane %v2465_v34, %v3538_v52  ;;  %v428_v1 = vrot.slane %v3585_v22, %v3520_v46  ;;  %v432_v57 = vrot.slane %v3585_v22, %v3523_v47  ;;  %v436_v29 = vrot.slane %v3585_v22, %v3526_v48 }
  0xff   :  { %v2494_v35 = vrot.slane %v2466_v9, %v3538_v52  ;;  %v440_v6 = vrot.slane %v3585_v22, %v3529_v49  ;;  %1649 = vperm.xlu1 %3327, %v958_v61   ;;  %v2495_v10 = vcombine.low %v2473_v53, %v2480_v28  ;;  %v444_v13 = vrot.slane %v3585_v22, %v3535_v51 }
 0x100   :  { %v3355_v8 = vpop.eup %3354  ;;  %v959_v14 = vcombine.low %v416_v12, %v420_v56  ;;  %v960_v18 = vcombine.low %v424_v45, %v428_v1  ;;  %v961_v2 = vcombine.low %v432_v57, %v436_v29  ;;  %3356 = vrsqrt.f32 %v3815_v5 }
 0x101   :  { %v265_v62 = vmul.f32 %v3355_v8, %v3762_v39  ;;  %v2496_v15 = vcombine.low %v2487_v63, %v2494_v35  ;;  %v2503_v20 = vrot.slane %v2495_v10, %v3538_v52  ;;  %v962_v21 = vcombine.low %v440_v6, %v444_v13 }
 0x102   :  { %v969_v24 = vrot.slane %v959_v14, %v3538_v52  ;;  %v976_v55 = vrot.slane %v960_v18, %v3538_v52  ;;  %v3833_v26 = vmul.f32 %v3768_v41, %v3768_v41  ;;  %v983_v34 = vrot.slane %v961_v2, %v3538_v52 }
 0x103   :  { %v267_v22 = vsel %vm266_vm11, %v3762_v39, %v265_v62  ;;  %v2510_v27 = vrot.slane %v2496_v15, %v3538_v52  ;;  %v3840_v12 = vmul.f32 %v313_v60, %v313_v60  ;;  %v990_v53 = vrot.slane %v962_v21, %v3538_v52 }
 0x104   :  { %v270_v9 = vsel %vm268_vm12, %v269_v4, %v267_v22  ;;  %v991_v56 = vcombine.low %v969_v24, %v976_v55  ;;  %vm273_vm13 = vcmp.eq.f32.partialorder %v3815_v5, inf  ;;  %vm275_vm14 = vcmp.eq.f32.partialorder %v3815_v5, 0.0 }
 0x105   :  { %v298_v45 = vsub.f32 2.0, %v270_v9  ;;  %v2511_v61 = vcombine.low %v2503_v20, %v2510_v27  ;;  %v992_v41 = vcombine.low %v983_v34, %v990_v53  ;;  %v448_v63 = vrot.slane %v3598_v30, %v3509_v42 }
 0x106   :  { %v999_v28 = vrot.slane %v991_v56, %v3538_v52  ;;  %v452_v60 = vrot.slane %v3598_v30, %v3512_v43  ;;  %v276_v39 = vand.u32 2147483648, %v3815_v5  ;;  %v456_v4 = vrot.slane %v3598_v30, %v3515_v44 }
 0x107   :  { %3156 = vperm.xlu0 %3326, %v2511_v61   ;;  %v460_v1 = vrot.slane %v3598_v30, %v3520_v46  ;;  %v464_v35 = vrot.slane %v3598_v30, %v3523_v47  ;;  %v1006_v57 = vrot.slane %v992_v41, %v3538_v52  ;;  %v468_v29 = vrot.slane %v3598_v30, %v3526_v48 }
 0x108   :  { %v472_v6 = vrot.slane %v3598_v30, %v3529_v49  ;;  %v476_v8 = vrot.slane %v3598_v30, %v3535_v51  ;;  %v314_v10 = vmax.f32 %v298_v45, 0.0  ;;  %v1008_v13 = vcombine.low %v448_v63, %v452_v60 }
 0x109   :  { %v1009_v14 = vcombine.low %v456_v4, %v460_v1  ;;  %v1984_v18 = vrot.slane %v3655_v19, %v3509_v42  ;;  %v1007_v62 = vcombine.low %v999_v28, %v1006_v57  ;;  %v1010_v15 = vcombine.low %v464_v35, %v468_v29  ;;  %v3890_v35 = vpop.xlane.xlu1 %170 }
 0x10a   :  { %v1011_v2 = vcombine.low %v472_v6, %v476_v8  ;;  %v1988_v20 = vrot.slane %v3655_v19, %v3512_v43  ;;  %v3357_v21 = vpop.eup %3356  ;;  %v1018_v24 = vrot.slane %v1008_v13, %v3538_v52  ;;  %v1992_v30 = vrot.slane %v3655_v19, %v3515_v44 }
 0x10b   :  { %v1025_v55 = vrot.slane %v1009_v14, %v3538_v52  ;;  %v1996_v22 = vrot.slane %v3655_v19, %v3520_v46  ;;  %1652 = vperm.xlu1 %3327, %v1007_v62   ;;  %v272_v27 = vmul.f32 %v3357_v21, %v3815_v5  ;;  %v1032_v34 = vrot.slane %v1010_v15, %v3538_v52 }
 0x10c   :  { %v1039_v53 = vrot.slane %v1011_v2, %v3538_v52  ;;  %v2000_v56 = vrot.slane %v3655_v19, %v3523_v47  ;;  %v2004_v61 = vrot.slane %v3655_v19, %v3526_v48  ;;  %v2008_v41 = vrot.slane %v3655_v19, %v3529_v49 }
 0x10d   :  { %v1040_v45 = vcombine.low %v1018_v24, %v1025_v55  ;;  %v2012_v28 = vrot.slane %v3655_v19, %v3535_v51  ;;  %v274_v63 = vsel %vm273_vm13, %v3815_v5, %v272_v27  ;;  %v2561_v4 = vcombine.low %v1984_v18, %v1988_v20 }
 0x10e   :  { %v1041_v60 = vcombine.low %v1032_v34, %v1039_v53  ;;  %v2562_v1 = vcombine.low %v1992_v30, %v1996_v22  ;;  %v277_v57 = vsel %vm275_vm14, %v276_v39, %v274_v63  ;;  %v2563_v6 = vcombine.low %v2000_v56, %v2004_v61 }
 0x10f   :  { %v1048_v29 = vrot.slane %v1040_v45, %v3538_v52  ;;  %v2564_v8 = vcombine.low %v2008_v41, %v2012_v28  ;;  %v3895_v13 = vmul.f32 %v270_v9, %v270_v9  ;;  %v299_v14 = vsub.f32 2.0, %v277_v57 }
 0x110   :  { %v1055_v19 = vrot.slane %v1041_v60, %v3538_v52  ;;  %v2571_v62 = vrot.slane %v2561_v4, %v3538_v52  ;;  %v2578_v15 = vrot.slane %v2562_v1, %v3538_v52  ;;  %v2585_v18 = vrot.slane %v2563_v6, %v3538_v52 }
 0x111   :  { %v2592_v2 = vrot.slane %v2564_v8, %v3538_v52  ;;  %3358 = vrsqrt.f32 %v3890_v35  ;;  %v3903_v5 = vmul.f32 %v314_v10, %v314_v10  ;;  %v315_v39 = vmax.f32 %v299_v14, 0.0 }
 0x112   :  { %v3905_v20 = vmul.f32 %v277_v57, %v277_v57  ;;  %v1056_v9 = vcombine.low %v1048_v29, %v1055_v19  ;;  %v2593_v21 = vcombine.low %v2571_v62, %v2578_v15  ;;  %vm280_vm15 = vcmp.eq.f32.partialorder %v3890_v35, inf }
 0x113   :  { %v2594_v24 = vcombine.low %v2585_v18, %v2592_v2  ;;  %v283_v55 = vand.u32 2147483648, %v3890_v35  ;;  %v480_v30 = vrot.slane %v3640_v11, %v3509_v42  ;;  %v3911_v22 = vmul.f32 %v315_v39, %v315_v39 }
 0x114   :  { %1655 = vperm.xlu1 %3327, %v1056_v9   ;;  %vm282_vm0 = vcmp.eq.f32.partialorder %v3890_v35, 0.0  ;;  %v484_v10 = vrot.slane %v3640_v11, %v3512_v43  ;;  %v488_v27 = vrot.slane %v3640_v11, %v3515_v44  ;;  %v492_v34 = vrot.slane %v3640_v11, %v3520_v46 }
 0x115   :  { %v2601_v53 = vrot.slane %v2593_v21, %v3538_v52  ;;  %v2608_v56 = vrot.slane %v2594_v24, %v3538_v52  ;;  %v496_v45 = vrot.slane %v3640_v11, %v3523_v47  ;;  %v500_v61 = vrot.slane %v3640_v11, %v3526_v48 }
 0x116   :  { %v504_v41 = vrot.slane %v3640_v11, %v3529_v49  ;;  %v508_v28 = vrot.slane %v3640_v11, %v3535_v51  ;;  %v1057_v63 = vcombine.low %v480_v30, %v484_v10  ;;  %v1058_v60 = vcombine.low %v488_v27, %v492_v34 }
 0x117   :  { %v2609_v4 = vcombine.low %v2601_v53, %v2608_v56  ;;  %v1059_v1 = vcombine.low %v496_v45, %v500_v61  ;;  %v2048_v57 = vrot.slane %v3670_v36, %v3509_v42  ;;  %v2052_v29 = vrot.slane %v3670_v36, %v3512_v43 }
 0x118   :  { %v1060_v6 = vcombine.low %v504_v41, %v508_v28  ;;  %v1067_v8 = vrot.slane %v1057_v63, %v3538_v52  ;;  %v1074_v14 = vrot.slane %v1058_v60, %v3538_v52  ;;  %v2056_v19 = vrot.slane %v3670_v36, %v3515_v44 }
 0x119   :  { %3162 = vperm.xlu0 %3326, %v2609_v4   ;;  %v1081_v11 = vrot.slane %v1059_v1, %v3538_v52  ;;  %v2060_v62 = vrot.slane %v3670_v36, %v3520_v46  ;;  %v2064_v15 = vrot.slane %v3670_v36, %v3523_v47  ;;  %v2068_v18 = vrot.slane %v3670_v36, %v3526_v48 }
 0x11a   :  { %v1088_v2 = vrot.slane %v1060_v6, %v3538_v52  ;;  %v1089_v39 = vcombine.low %v1067_v8, %v1074_v14  ;;  %v2072_v9 = vrot.slane %v3670_v36, %v3529_v49  ;;  %v2076_v21 = vrot.slane %v3670_v36, %v3535_v51 }
 0x11b   :  { %v3359_v24 = vpop.eup %3358  ;;  %v2659_v30 = vcombine.low %v2048_v57, %v2052_v29  ;;  %v2660_v10 = vcombine.low %v2056_v19, %v2060_v62  ;;  %v2661_v27 = vcombine.low %v2064_v15, %v2068_v18  ;;  %v512_v34 = vrot.slane %v3634_v7, %v3509_v42 }
 0x11c   :  { %v279_v53 = vmul.f32 %v3359_v24, %v3890_v35  ;;  %v1090_v56 = vcombine.low %v1081_v11, %v1088_v2  ;;  %v1097_v45 = vrot.slane %v1089_v39, %v3538_v52  ;;  %v2662_v61 = vcombine.low %v2072_v9, %v2076_v21 }
 0x11d   :  { %v2669_v41 = vrot.slane %v2659_v30, %v3538_v52  ;;  %v2676_v28 = vrot.slane %v2660_v10, %v3538_v52  ;;  %v2683_v63 = vrot.slane %v2661_v27, %v3538_v52  ;;  %v516_v36 = vrot.slane %v3634_v7, %v3512_v43 }
 0x11e   :  { %v281_v60 = vsel %vm280_vm15, %v3890_v35, %v279_v53  ;;  %v1104_v4 = vrot.slane %v1090_v56, %v3538_v52  ;;  %v2690_v1 = vrot.slane %v2662_v61, %v3538_v52  ;;  %v520_v57 = vrot.slane %v3634_v7, %v3515_v44 }
 0x11f   :  { %v284_v29 = vsel %vm282_vm0, %v283_v55, %v281_v60  ;;  %v2691_v6 = vcombine.low %v2669_v41, %v2676_v28  ;;  %v524_v8 = vrot.slane %v3634_v7, %v3520_v46  ;;  %v528_v14 = vrot.slane %v3634_v7, %v3523_v47 }
 0x120   :  { %v300_v19 = vsub.f32 2.0, %v284_v29  ;;  %v3972_v11 = vmul.f32 %v284_v29, %v284_v29  ;;  %v1105_v62 = vcombine.low %v1097_v45, %v1104_v4  ;;  %v2692_v15 = vcombine.low %v2683_v63, %v2690_v1 }
 0x121   :  { %v2699_v18 = vrot.slane %v2691_v6, %v3538_v52  ;;  %v532_v2 = vrot.slane %v3634_v7, %v3526_v48  ;;  %v536_v35 = vrot.slane %v3634_v7, %v3529_v49  ;;  %v540_v55 = vrot.slane %v3634_v7, %v3535_v51 }
 0x122   :  { %v316_v39 = vmax.f32 %v300_v19, 0.0  ;;  %1658 = vperm.xlu1 %3327, %v1105_v62   ;;  %v2706_v9 = vrot.slane %v2692_v15, %v3538_v52  ;;  %v1106_v21 = vcombine.low %v512_v34, %v516_v36  ;;  %v1107_v24 = vcombine.low %v520_v57, %v524_v8 }
 0x123   :  { %v1108_v30 = vcombine.low %v528_v14, %v532_v2  ;;  %v1109_v10 = vcombine.low %v536_v35, %v540_v55  ;;  %v2112_v27 = vrot.slane %v3695_v50, %v3509_v42  ;;  %v2116_v53 = vrot.slane %v3695_v50, %v3512_v43 }
 0x124   :  { %v3986_v56 = vmul.f32 %v316_v39, %v316_v39  ;;  %v2707_v45 = vcombine.low %v2699_v18, %v2706_v9  ;;  %v1116_v61 = vrot.slane %v1106_v21, %v3538_v52  ;;  %v1123_v7 = vrot.slane %v1107_v24, %v3538_v52 }
 0x125   :  { %v1130_v41 = vrot.slane %v1108_v30, %v3538_v52  ;;  %v1137_v34 = vrot.slane %v1109_v10, %v3538_v52  ;;  %v2120_v28 = vrot.slane %v3695_v50, %v3515_v44  ;;  %v2124_v63 = vrot.slane %v3695_v50, %v3520_v46 }
 0x126   :  { %3168 = vperm.xlu0 %3326, %v2707_v45   ;;  %v1138_v36 = vcombine.low %v1116_v61, %v1123_v7  ;;  %v2128_v60 = vrot.slane %v3695_v50, %v3523_v47  ;;  %v2132_v4 = vrot.slane %v3695_v50, %v3526_v48  ;;  %v2136_v1 = vrot.slane %v3695_v50, %v3529_v49 }
 0x127   :  { %v1139_v57 = vcombine.low %v1130_v41, %v1137_v34  ;;  %v2140_v29 = vrot.slane %v3695_v50, %v3535_v51  ;;  %v2757_v6 = vcombine.low %v2112_v27, %v2116_v53  ;;  %v2758_v8 = vcombine.low %v2120_v28, %v2124_v63 }
 0x128   :  { %v1146_v14 = vrot.slane %v1138_v36, %v3538_v52  ;;  %v2759_v19 = vcombine.low %v2128_v60, %v2132_v4  ;;  %v544_v62 = vrot.slane %v3661_v25, %v3509_v42  ;;  %v548_v15 = vrot.slane %v3661_v25, %v3512_v43 }
 0x129   :  { %v1153_v18 = vrot.slane %v1139_v57, %v3538_v52  ;;  %v2760_v2 = vcombine.low %v2136_v1, %v2140_v29  ;;  %v2767_v35 = vrot.slane %v2757_v6, %v3538_v52  ;;  %v2774_v55 = vrot.slane %v2758_v8, %v3538_v52 }
 0x12a   :  { %v2781_v50 = vrot.slane %v2759_v19, %v3538_v52  ;;  %v552_v39 = vrot.slane %v3661_v25, %v3515_v44  ;;  %v556_v9 = vrot.slane %v3661_v25, %v3520_v46  ;;  %v560_v21 = vrot.slane %v3661_v25, %v3523_v47 }
 0x12b   :  { %v1154_v24 = vcombine.low %v1146_v14, %v1153_v18  ;;  %v2788_v30 = vrot.slane %v2760_v2, %v3538_v52  ;;  %v2789_v10 = vcombine.low %v2767_v35, %v2774_v55  ;;  %v564_v27 = vrot.slane %v3661_v25, %v3526_v48 }
 0x12c   :  { %v568_v53 = vrot.slane %v3661_v25, %v3529_v49  ;;  %v572_v45 = vrot.slane %v3661_v25, %v3535_v51  ;;  %v1155_v61 = vcombine.low %v544_v62, %v548_v15  ;;  %v1156_v7 = vcombine.low %v552_v39, %v556_v9 }
 0x12d   :  { %1661 = vperm.xlu1 %3327, %v1154_v24   ;;  %v2790_v41 = vcombine.low %v2781_v50, %v2788_v30  ;;  %v2797_v34 = vrot.slane %v2789_v10, %v3538_v52  ;;  %v1157_v28 = vcombine.low %v560_v21, %v564_v27  ;;  %v2144_v63 = vrot.slane %v3704_v59, %v3509_v42 }
 0x12e   :  { %v1158_v36 = vcombine.low %v568_v53, %v572_v45  ;;  %v1165_v60 = vrot.slane %v1155_v61, %v3538_v52  ;;  %v1172_v4 = vrot.slane %v1156_v7, %v3538_v52  ;;  %v2148_v1 = vrot.slane %v3704_v59, %v3512_v43 }
 0x12f   :  { %v2804_v25 = vrot.slane %v2790_v41, %v3538_v52  ;;  %v1179_v57 = vrot.slane %v1157_v28, %v3538_v52  ;;  %v2152_v29 = vrot.slane %v3704_v59, %v3515_v44  ;;  %v2156_v6 = vrot.slane %v3704_v59, %v3520_v46 }
 0x130   :  { %v1186_v8 = vrot.slane %v1158_v36, %v3538_v52  ;;  %v1187_v14 = vcombine.low %v1165_v60, %v1172_v4  ;;  %v2160_v19 = vrot.slane %v3704_v59, %v3523_v47  ;;  %v2164_v62 = vrot.slane %v3704_v59, %v3526_v48 }
 0x131   :  { %v2805_v15 = vcombine.low %v2797_v34, %v2804_v25  ;;  %v2168_v18 = vrot.slane %v3704_v59, %v3529_v49  ;;  %v2172_v2 = vrot.slane %v3704_v59, %v3535_v51  ;;  %v2806_v35 = vcombine.low %v2144_v63, %v2148_v1 }
 0x132   :  { %v1188_v55 = vcombine.low %v1179_v57, %v1186_v8  ;;  %v1195_v50 = vrot.slane %v1187_v14, %v3538_v52  ;;  %v2807_v39 = vcombine.low %v2152_v29, %v2156_v6  ;;  %v2808_v9 = vcombine.low %v2160_v19, %v2164_v62 }
 0x133   :  { %3174 = vperm.xlu0 %3326, %v2805_v15   ;;  %v2809_v21 = vcombine.low %v2168_v18, %v2172_v2  ;;  %v2816_v24 = vrot.slane %v2806_v35, %v3538_v52  ;;  %v576_v30 = vrot.slane %v3645_v17, %v3509_v42  ;;  %v580_v10 = vrot.slane %v3645_v17, %v3512_v43 }
 0x134   :  { %v1202_v27 = vrot.slane %v1188_v55, %v3538_v52  ;;  %v2823_v59 = vrot.slane %v2807_v39, %v3538_v52  ;;  %v2830_v53 = vrot.slane %v2808_v9, %v3538_v52  ;;  %v584_v45 = vrot.slane %v3645_v17, %v3515_v44 }
 0x135   :  { %v2837_v61 = vrot.slane %v2809_v21, %v3538_v52  ;;  %v588_v7 = vrot.slane %v3645_v17, %v3520_v46  ;;  %v592_v41 = vrot.slane %v3645_v17, %v3523_v47  ;;  %v596_v34 = vrot.slane %v3645_v17, %v3526_v48 }
 0x136   :  { %v1203_v28 = vcombine.low %v1195_v50, %v1202_v27  ;;  %v2838_v63 = vcombine.low %v2816_v24, %v2823_v59  ;;  %v600_v36 = vrot.slane %v3645_v17, %v3529_v49  ;;  %v604_v60 = vrot.slane %v3645_v17, %v3535_v51 }
 0x137   :  { %v2839_v4 = vcombine.low %v2830_v53, %v2837_v61  ;;  %v1204_v1 = vcombine.low %v576_v30, %v580_v10  ;;  %v1205_v25 = vcombine.low %v584_v45, %v588_v7  ;;  %v1206_v57 = vcombine.low %v592_v41, %v596_v34 }
 0x138   :  { %1664 = vperm.xlu1 %3327, %v1203_v28   ;;  %v2846_v29 = vrot.slane %v2838_v63, %v3538_v52  ;;  %v1207_v6 = vcombine.low %v600_v36, %v604_v60  ;;  %v2176_v8 = vrot.slane %v3771_v58, %v3509_v42  ;;  %v2180_v14 = vrot.slane %v3771_v58, %v3512_v43 }
 0x139   :  { %v2853_v19 = vrot.slane %v2839_v4, %v3538_v52  ;;  %v1214_v62 = vrot.slane %v1204_v1, %v3538_v52  ;;  %v1221_v17 = vrot.slane %v1205_v25, %v3538_v52  ;;  %v1228_v15 = vrot.slane %v1206_v57, %v3538_v52 }
 0x13a   :  { %v1235_v18 = vrot.slane %v1207_v6, %v3538_v52  ;;  %v2184_v2 = vrot.slane %v3771_v58, %v3515_v44  ;;  %v2188_v35 = vrot.slane %v3771_v58, %v3520_v46  ;;  %v2192_v55 = vrot.slane %v3771_v58, %v3523_v47 }
 0x13b   :  { %v2854_v50 = vcombine.low %v2846_v29, %v2853_v19  ;;  %v1236_v39 = vcombine.low %v1214_v62, %v1221_v17  ;;  %v2196_v9 = vrot.slane %v3771_v58, %v3526_v48  ;;  %v2200_v21 = vrot.slane %v3771_v58, %v3529_v49 }
 0x13c   :  { %v1237_v24 = vcombine.low %v1228_v15, %v1235_v18  ;;  %v2204_v30 = vrot.slane %v3771_v58, %v3535_v51  ;;  %v2855_v10 = vcombine.low %v2176_v8, %v2180_v14  ;;  %v2856_v27 = vcombine.low %v2184_v2, %v2188_v35 }
 0x13d   :  { %3177 = vperm.xlu0 %3326, %v2854_v50   ;;  %v1244_v59 = vrot.slane %v1236_v39, %v3538_v52  ;;  %v2857_v53 = vcombine.low %v2192_v55, %v2196_v9  ;;  %v608_v45 = vrot.slane %v3666_v32, %v3509_v42  ;;  %v612_v61 = vrot.slane %v3666_v32, %v3512_v43 }
 0x13e   :  { %v1251_v7 = vrot.slane %v1237_v24, %v3538_v52  ;;  %v2858_v41 = vcombine.low %v2200_v21, %v2204_v30  ;;  %v2865_v34 = vrot.slane %v2855_v10, %v3538_v52  ;;  %v2872_v28 = vrot.slane %v2856_v27, %v3538_v52 }
 0x13f   :  { %v2879_v58 = vrot.slane %v2857_v53, %v3538_v52  ;;  %v616_v63 = vrot.slane %v3666_v32, %v3515_v44  ;;  %v620_v36 = vrot.slane %v3666_v32, %v3520_v46  ;;  %v624_v60 = vrot.slane %v3666_v32, %v3523_v47 }
 0x140   :  { %v1252_v4 = vcombine.low %v1244_v59, %v1251_v7  ;;  %v2886_v1 = vrot.slane %v2858_v41, %v3538_v52  ;;  %v2887_v25 = vcombine.low %v2865_v34, %v2872_v28  ;;  %v628_v57 = vrot.slane %v3666_v32, %v3526_v48 }
 0x141   :  { %v632_v29 = vrot.slane %v3666_v32, %v3529_v49  ;;  %v636_v6 = vrot.slane %v3666_v32, %v3535_v51  ;;  %v1253_v8 = vcombine.low %v608_v45, %v612_v61  ;;  %v1254_v14 = vcombine.low %v616_v63, %v620_v36 }
 0x142   :  { %1667 = vperm.xlu1 %3327, %v1252_v4   ;;  %v2888_v19 = vcombine.low %v2879_v58, %v2886_v1  ;;  %v2895_v62 = vrot.slane %v2887_v25, %v3538_v52  ;;  %v1255_v17 = vcombine.low %v624_v60, %v628_v57  ;;  %v2208_v15 = vrot.slane %v3778_v54, %v3509_v42 }
 0x143   :  { %v1256_v18 = vcombine.low %v632_v29, %v636_v6  ;;  %v1263_v2 = vrot.slane %v1253_v8, %v3538_v52  ;;  %v1270_v35 = vrot.slane %v1254_v14, %v3538_v52  ;;  %v2212_v55 = vrot.slane %v3778_v54, %v3512_v43 }
 0x144   :  { %v2902_v32 = vrot.slane %v2888_v19, %v3538_v52  ;;  %v1277_v50 = vrot.slane %v1255_v17, %v3538_v52  ;;  %v2216_v39 = vrot.slane %v3778_v54, %v3515_v44  ;;  %v2220_v9 = vrot.slane %v3778_v54, %v3520_v46 }
 0x145   :  { %v1284_v21 = vrot.slane %v1256_v18, %v3538_v52  ;;  %v1285_v24 = vcombine.low %v1263_v2, %v1270_v35  ;;  %v2224_v30 = vrot.slane %v3778_v54, %v3523_v47  ;;  %v2228_v10 = vrot.slane %v3778_v54, %v3526_v48 }
 0x146   :  { %v2903_v27 = vcombine.low %v2895_v62, %v2902_v32  ;;  %v2232_v59 = vrot.slane %v3778_v54, %v3529_v49  ;;  %v2236_v53 = vrot.slane %v3778_v54, %v3535_v51  ;;  %v2904_v45 = vcombine.low %v2208_v15, %v2212_v55 }
 0x147   :  { %v1286_v61 = vcombine.low %v1277_v50, %v1284_v21  ;;  %v1293_v7 = vrot.slane %v1285_v24, %v3538_v52  ;;  %v2905_v41 = vcombine.low %v2216_v39, %v2220_v9  ;;  %v2906_v34 = vcombine.low %v2224_v30, %v2228_v10 }
 0x148   :  { %3180 = vperm.xlu0 %3326, %v2903_v27   ;;  %v2907_v28 = vcombine.low %v2232_v59, %v2236_v53  ;;  %v2914_v58 = vrot.slane %v2904_v45, %v3538_v52  ;;  %v640_v63 = vrot.slane %v3672_v37, %v3509_v42  ;;  %v644_v36 = vrot.slane %v3672_v37, %v3512_v43 }
 0x149   :  { %v1300_v60 = vrot.slane %v1286_v61, %v3538_v52  ;;  %v2921_v54 = vrot.slane %v2905_v41, %v3538_v52  ;;  %v2928_v4 = vrot.slane %v2906_v34, %v3538_v52  ;;  %v648_v1 = vrot.slane %v3672_v37, %v3515_v44 }
 0x14a   :  { %v2935_v25 = vrot.slane %v2907_v28, %v3538_v52  ;;  %v652_v57 = vrot.slane %v3672_v37, %v3520_v46  ;;  %v656_v29 = vrot.slane %v3672_v37, %v3523_v47  ;;  %v660_v6 = vrot.slane %v3672_v37, %v3526_v48 }
 0x14b   :  { %v1301_v8 = vcombine.low %v1293_v7, %v1300_v60  ;;  %v2936_v14 = vcombine.low %v2914_v58, %v2921_v54  ;;  %v664_v19 = vrot.slane %v3672_v37, %v3529_v49  ;;  %v668_v62 = vrot.slane %v3672_v37, %v3535_v51 }
 0x14c   :  { %v2937_v17 = vcombine.low %v2928_v4, %v2935_v25  ;;  %v1302_v15 = vcombine.low %v640_v63, %v644_v36  ;;  %v1303_v18 = vcombine.low %v648_v1, %v652_v57  ;;  %v1304_v2 = vcombine.low %v656_v29, %v660_v6 }
 0x14d   :  { %1670 = vperm.xlu1 %3327, %v1301_v8   ;;  %v2944_v35 = vrot.slane %v2936_v14, %v3538_v52  ;;  %v1305_v55 = vcombine.low %v664_v19, %v668_v62  ;;  %v2240_v32 = vrot.slane %v3840_v12, %v3509_v42  ;;  %v2244_v50 = vrot.slane %v3840_v12, %v3512_v43 }
 0x14e   :  { %v2951_v39 = vrot.slane %v2937_v17, %v3538_v52  ;;  %v1312_v9 = vrot.slane %v1302_v15, %v3538_v52  ;;  %v1319_v37 = vrot.slane %v1303_v18, %v3538_v52  ;;  %v1326_v21 = vrot.slane %v1304_v2, %v3538_v52 }
 0x14f   :  { %v1333_v24 = vrot.slane %v1305_v55, %v3538_v52  ;;  %v2248_v30 = vrot.slane %v3840_v12, %v3515_v44  ;;  %v2252_v10 = vrot.slane %v3840_v12, %v3520_v46  ;;  %v2256_v27 = vrot.slane %v3840_v12, %v3523_v47 }
 0x150   :  { %v2952_v59 = vcombine.low %v2944_v35, %v2951_v39  ;;  %v1334_v53 = vcombine.low %v1312_v9, %v1319_v37  ;;  %v2260_v45 = vrot.slane %v3840_v12, %v3526_v48  ;;  %v2264_v61 = vrot.slane %v3840_v12, %v3529_v49 }
 0x151   :  { %v1335_v7 = vcombine.low %v1326_v21, %v1333_v24  ;;  %v2268_v41 = vrot.slane %v3840_v12, %v3535_v51  ;;  %v2953_v34 = vcombine.low %v2240_v32, %v2244_v50  ;;  %v2954_v28 = vcombine.low %v2248_v30, %v2252_v10 }
 0x152   :  { %3183 = vperm.xlu0 %3326, %v2952_v59   ;;  %v1342_v58 = vrot.slane %v1334_v53, %v3538_v52  ;;  %v2955_v63 = vcombine.low %v2256_v27, %v2260_v45  ;;  %v672_v36 = vrot.slane %v3764_v40, %v3509_v42  ;;  %v676_v60 = vrot.slane %v3764_v40, %v3512_v43 }
 0x153   :  { %v1349_v54 = vrot.slane %v1335_v7, %v3538_v52  ;;  %v2956_v4 = vcombine.low %v2264_v61, %v2268_v41  ;;  %v2963_v1 = vrot.slane %v2953_v34, %v3538_v52  ;;  %v2970_v25 = vrot.slane %v2954_v28, %v3538_v52 }
 0x154   :  { %v2977_v12 = vrot.slane %v2955_v63, %v3538_v52  ;;  %v680_v57 = vrot.slane %v3764_v40, %v3515_v44  ;;  %v684_v29 = vrot.slane %v3764_v40, %v3520_v46  ;;  %v688_v6 = vrot.slane %v3764_v40, %v3523_v47 }
 0x155   :  { %v1350_v8 = vcombine.low %v1342_v58, %v1349_v54  ;;  %v2984_v14 = vrot.slane %v2956_v4, %v3538_v52  ;;  %v2985_v19 = vcombine.low %v2963_v1, %v2970_v25  ;;  %v692_v62 = vrot.slane %v3764_v40, %v3526_v48 }
 0x156   :  { %v696_v17 = vrot.slane %v3764_v40, %v3529_v49  ;;  %v700_v15 = vrot.slane %v3764_v40, %v3535_v51  ;;  %v1351_v18 = vcombine.low %v672_v36, %v676_v60  ;;  %v1352_v2 = vcombine.low %v680_v57, %v684_v29 }
 0x157   :  { %1673 = vperm.xlu1 %3327, %v1350_v8   ;;  %v2986_v35 = vcombine.low %v2977_v12, %v2984_v14  ;;  %v2993_v55 = vrot.slane %v2985_v19, %v3538_v52  ;;  %v1353_v32 = vcombine.low %v688_v6, %v692_v62  ;;  %v2272_v50 = vrot.slane %v3903_v5, %v3509_v42 }
 0x158   :  { %v1354_v39 = vcombine.low %v696_v17, %v700_v15  ;;  %v1361_v9 = vrot.slane %v1351_v18, %v3538_v52  ;;  %v1368_v37 = vrot.slane %v1352_v2, %v3538_v52  ;;  %v2276_v21 = vrot.slane %v3903_v5, %v3512_v43 }
 0x159   :  { %v3000_v40 = vrot.slane %v2986_v35, %v3538_v52  ;;  %v1375_v24 = vrot.slane %v1353_v32, %v3538_v52  ;;  %v2280_v30 = vrot.slane %v3903_v5, %v3515_v44  ;;  %v2284_v10 = vrot.slane %v3903_v5, %v3520_v46 }
 0x15a   :  { %v1382_v27 = vrot.slane %v1354_v39, %v3538_v52  ;;  %v1383_v59 = vcombine.low %v1361_v9, %v1368_v37  ;;  %v2288_v53 = vrot.slane %v3903_v5, %v3523_v47  ;;  %v2292_v45 = vrot.slane %v3903_v5, %v3526_v48 }
 0x15b   :  { %v3001_v61 = vcombine.low %v2993_v55, %v3000_v40  ;;  %v2296_v7 = vrot.slane %v3903_v5, %v3529_v49  ;;  %v2300_v41 = vrot.slane %v3903_v5, %v3535_v51  ;;  %v3002_v34 = vcombine.low %v2272_v50, %v2276_v21 }
 0x15c   :  { %v1384_v28 = vcombine.low %v1375_v24, %v1382_v27  ;;  %v1391_v58 = vrot.slane %v1383_v59, %v3538_v52  ;;  %v3003_v63 = vcombine.low %v2280_v30, %v2284_v10  ;;  %v3004_v36 = vcombine.low %v2288_v53, %v2292_v45 }
 0x15d   :  { %3186 = vperm.xlu0 %3326, %v3001_v61   ;;  %v3005_v60 = vcombine.low %v2296_v7, %v2300_v41  ;;  %v3012_v54 = vrot.slane %v3002_v34, %v3538_v52  ;;  %v704_v4 = vrot.slane %v3776_v23, %v3509_v42  ;;  %v708_v1 = vrot.slane %v3776_v23, %v3512_v43 }
 0x15e   :  { %v1398_v25 = vrot.slane %v1384_v28, %v3538_v52  ;;  %v3019_v5 = vrot.slane %v3003_v63, %v3538_v52  ;;  %v3026_v12 = vrot.slane %v3004_v36, %v3538_v52  ;;  %v712_v57 = vrot.slane %v3776_v23, %v3515_v44 }
 0x15f   :  { %v3033_v29 = vrot.slane %v3005_v60, %v3538_v52  ;;  %v716_v6 = vrot.slane %v3776_v23, %v3520_v46  ;;  %v720_v8 = vrot.slane %v3776_v23, %v3523_v47  ;;  %v724_v14 = vrot.slane %v3776_v23, %v3526_v48 }
 0x160   :  { %v1399_v19 = vcombine.low %v1391_v58, %v1398_v25  ;;  %v3034_v62 = vcombine.low %v3012_v54, %v3019_v5  ;;  %v728_v17 = vrot.slane %v3776_v23, %v3529_v49  ;;  %v732_v15 = vrot.slane %v3776_v23, %v3535_v51 }
 0x161   :  { %v3035_v18 = vcombine.low %v3026_v12, %v3033_v29  ;;  %v1400_v2 = vcombine.low %v704_v4, %v708_v1  ;;  %v1401_v35 = vcombine.low %v712_v57, %v716_v6  ;;  %v1402_v55 = vcombine.low %v720_v8, %v724_v14 }
 0x162   :  { %1676 = vperm.xlu1 %3327, %v1399_v19   ;;  %v3042_v32 = vrot.slane %v3034_v62, %v3538_v52  ;;  %v1403_v50 = vcombine.low %v728_v17, %v732_v15  ;;  %v2304_v39 = vrot.slane %v3911_v22, %v3509_v42  ;;  %v2308_v9 = vrot.slane %v3911_v22, %v3512_v43 }
 0x163   :  { %v3049_v37 = vrot.slane %v3035_v18, %v3538_v52  ;;  %v1410_v21 = vrot.slane %v1400_v2, %v3538_v52  ;;  %v1417_v23 = vrot.slane %v1401_v35, %v3538_v52  ;;  %v1424_v40 = vrot.slane %v1402_v55, %v3538_v52 }
 0x164   :  { %v1431_v24 = vrot.slane %v1403_v50, %v3538_v52  ;;  %v2312_v30 = vrot.slane %v3911_v22, %v3515_v44  ;;  %v2316_v10 = vrot.slane %v3911_v22, %v3520_v46  ;;  %v2320_v27 = vrot.slane %v3911_v22, %v3523_v47 }
 0x165   :  { %v3050_v59 = vcombine.low %v3042_v32, %v3049_v37  ;;  %v1432_v53 = vcombine.low %v1410_v21, %v1417_v23  ;;  %v2324_v45 = vrot.slane %v3911_v22, %v3526_v48  ;;  %v2328_v61 = vrot.slane %v3911_v22, %v3529_v49 }
 0x166   :  { %v1433_v7 = vcombine.low %v1424_v40, %v1431_v24  ;;  %v2332_v41 = vrot.slane %v3911_v22, %v3535_v51  ;;  %v3051_v34 = vcombine.low %v2304_v39, %v2308_v9  ;;  %v3052_v28 = vcombine.low %v2312_v30, %v2316_v10 }
 0x167   :  { %3189 = vperm.xlu0 %3326, %v3050_v59   ;;  %v1440_v58 = vrot.slane %v1432_v53, %v3538_v52  ;;  %v3053_v63 = vcombine.low %v2320_v27, %v2324_v45  ;;  %v736_v36 = vrot.slane %v3833_v26, %v3509_v42  ;;  %v740_v60 = vrot.slane %v3833_v26, %v3512_v43 }
 0x168   :  { %v1447_v54 = vrot.slane %v1433_v7, %v3538_v52  ;;  %v3054_v4 = vcombine.low %v2328_v61, %v2332_v41  ;;  %v3061_v1 = vrot.slane %v3051_v34, %v3538_v52  ;;  %v3068_v25 = vrot.slane %v3052_v28, %v3538_v52 }
 0x169   :  { %v3075_v22 = vrot.slane %v3053_v63, %v3538_v52  ;;  %v744_v5 = vrot.slane %v3833_v26, %v3515_v44  ;;  %v748_v12 = vrot.slane %v3833_v26, %v3520_v46  ;;  %v752_v57 = vrot.slane %v3833_v26, %v3523_v47 }
 0x16a   :  { %v1448_v29 = vcombine.low %v1440_v58, %v1447_v54  ;;  %v3082_v6 = vrot.slane %v3054_v4, %v3538_v52  ;;  %v3083_v8 = vcombine.low %v3061_v1, %v3068_v25  ;;  %v756_v14 = vrot.slane %v3833_v26, %v3526_v48 }
 0x16b   :  { %v760_v19 = vrot.slane %v3833_v26, %v3529_v49  ;;  %v764_v62 = vrot.slane %v3833_v26, %v3535_v51  ;;  %v1449_v17 = vcombine.low %v736_v36, %v740_v60  ;;  %v1450_v15 = vcombine.low %v744_v5, %v748_v12 }
 0x16c   :  { %1679 = vperm.xlu1 %3327, %v1448_v29   ;;  %v3084_v18 = vcombine.low %v3075_v22, %v3082_v6  ;;  %v3091_v2 = vrot.slane %v3083_v8, %v3538_v52  ;;  %v1451_v35 = vcombine.low %v752_v57, %v756_v14  ;;  %v2336_v55 = vrot.slane %v3986_v56, %v3509_v42 }
 0x16d   :  { %v1452_v32 = vcombine.low %v760_v19, %v764_v62  ;;  %v1459_v50 = vrot.slane %v1449_v17, %v3538_v52  ;;  %v1466_v39 = vrot.slane %v1450_v15, %v3538_v52  ;;  %v2340_v9 = vrot.slane %v3986_v56, %v3512_v43 }
 0x16e   :  { %v3098_v26 = vrot.slane %v3084_v18, %v3538_v52  ;;  %v1473_v37 = vrot.slane %v1451_v35, %v3538_v52  ;;  %v2344_v21 = vrot.slane %v3986_v56, %v3515_v44  ;;  %v2348_v23 = vrot.slane %v3986_v56, %v3520_v46 }
 0x16f   :  { %v1480_v40 = vrot.slane %v1452_v32, %v3538_v52  ;;  %v1481_v24 = vcombine.low %v1459_v50, %v1466_v39  ;;  %v2352_v30 = vrot.slane %v3986_v56, %v3523_v47  ;;  %v2356_v10 = vrot.slane %v3986_v56, %v3526_v48 }
 0x170   :  { %v3099_v27 = vcombine.low %v3091_v2, %v3098_v26  ;;  %v2360_v59 = vrot.slane %v3986_v56, %v3529_v49  ;;  %v2364_v53 = vrot.slane %v3986_v56, %v3535_v51  ;;  %v3100_v45 = vcombine.low %v2336_v55, %v2340_v9 }
 0x171   :  { %v1482_v61 = vcombine.low %v1473_v37, %v1480_v40  ;;  %v1489_v7 = vrot.slane %v1481_v24, %v3538_v52  ;;  %v3101_v41 = vcombine.low %v2344_v21, %v2348_v23  ;;  %v3102_v34 = vcombine.low %v2352_v30, %v2356_v10 }
 0x172   :  { %3192 = vperm.xlu0 %3326, %v3099_v27   ;;  %v3103_v28 = vcombine.low %v2360_v59, %v2364_v53  ;;  %v3110_v58 = vrot.slane %v3100_v45, %v3538_v52  ;;  %v768_v63 = vrot.slane %v3895_v13, %v3509_v42  ;;  %v772_v36 = vrot.slane %v3895_v13, %v3512_v43 }
 0x173   :  { %v1496_v60 = vrot.slane %v1482_v61, %v3538_v52  ;;  %v3117_v56 = vrot.slane %v3101_v41, %v3538_v52  ;;  %v3124_v54 = vrot.slane %v3102_v34, %v3538_v52  ;;  %v776_v4 = vrot.slane %v3895_v13, %v3515_v44 }
 0x174   :  { %v3131_v1 = vrot.slane %v3103_v28, %v3538_v52  ;;  %v780_v25 = vrot.slane %v3895_v13, %v3520_v46  ;;  %v784_v22 = vrot.slane %v3895_v13, %v3523_v47  ;;  %v788_v5 = vrot.slane %v3895_v13, %v3526_v48 }
 0x175   :  { %v1497_v12 = vcombine.low %v1489_v7, %v1496_v60  ;;  %v3132_v57 = vcombine.low %v3110_v58, %v3117_v56  ;;  %v792_v29 = vrot.slane %v3895_v13, %v3529_v49  ;;  %v796_v6 = vrot.slane %v3895_v13, %v3535_v51 }
 0x176   :  { %v3133_v8 = vcombine.low %v3124_v54, %v3131_v1  ;;  %v1498_v14 = vcombine.low %v768_v63, %v772_v36  ;;  %v1499_v19 = vcombine.low %v776_v4, %v780_v25  ;;  %v1500_v62 = vcombine.low %v784_v22, %v788_v5 }
 0x177   :  { %1682 = vperm.xlu1 %3327, %v1497_v12   ;;  %v3140_v17 = vrot.slane %v3132_v57, %v3538_v52  ;;  %v1501_v15 = vcombine.low %v792_v29, %v796_v6  ;;  %v1888_v18 = vrot.slane %v3629_v3, %v3509_v42  ;;  %v1892_v2 = vrot.slane %v3629_v3, %v3512_v43 }
 0x178   :  { %v3147_v35 = vrot.slane %v3133_v8, %v3538_v52  ;;  %v1508_v55 = vrot.slane %v1498_v14, %v3538_v52  ;;  %v1515_v13 = vrot.slane %v1499_v19, %v3538_v52  ;;  %v1522_v32 = vrot.slane %v1500_v62, %v3538_v52 }
 0x179   :  { %v1529_v50 = vrot.slane %v1501_v15, %v3538_v52  ;;  %v1896_v39 = vrot.slane %v3629_v3, %v3515_v44  ;;  %v1900_v9 = vrot.slane %v3629_v3, %v3520_v46  ;;  %v1904_v26 = vrot.slane %v3629_v3, %v3523_v47 }
 0x17a   :  { %v3148_v37 = vcombine.low %v3140_v17, %v3147_v35  ;;  %v1530_v21 = vcombine.low %v1508_v55, %v1515_v13  ;;  %v1908_v23 = vrot.slane %v3629_v3, %v3526_v48  ;;  %v1912_v40 = vrot.slane %v3629_v3, %v3529_v49 }
 0x17b   :  { %v1531_v24 = vcombine.low %v1522_v32, %v1529_v50  ;;  %v1916_v30 = vrot.slane %v3629_v3, %v3535_v51  ;;  %v2414_v10 = vcombine.low %v1888_v18, %v1892_v2  ;;  %v2415_v27 = vcombine.low %v1896_v39, %v1900_v9 }
 0x17c   :  { %3195 = vperm.xlu0 %3326, %v3148_v37   ;;  %v1538_v59 = vrot.slane %v1530_v21, %v3538_v52  ;;  %v2416_v53 = vcombine.low %v1904_v26, %v1908_v23  ;;  %v1952_v45 = vrot.slane %v3624_v0, %v3509_v42  ;;  %v1956_v61 = vrot.slane %v3624_v0, %v3512_v43 }
 0x17d   :  { %v1545_v7 = vrot.slane %v1531_v24, %v3538_v52  ;;  %v2417_v41 = vcombine.low %v1912_v40, %v1916_v30  ;;  %v2424_v34 = vrot.slane %v2414_v10, %v3538_v52  ;;  %v2431_v28 = vrot.slane %v2415_v27, %v3538_v52 }
 0x17e   :  { %v2438_v3 = vrot.slane %v2416_v53, %v3538_v52  ;;  %v1960_v58 = vrot.slane %v3624_v0, %v3515_v44  ;;  %v1964_v63 = vrot.slane %v3624_v0, %v3520_v46  ;;  %v1968_v36 = vrot.slane %v3624_v0, %v3523_v47 }
 0x17f   :  { %v1546_v60 = vcombine.low %v1538_v59, %v1545_v7  ;;  %v2445_v56 = vrot.slane %v2417_v41, %v3538_v52  ;;  %v2446_v54 = vcombine.low %v2424_v34, %v2431_v28  ;;  %v1972_v4 = vrot.slane %v3624_v0, %v3526_v48 }
 0x180   :  { %v1976_v1 = vrot.slane %v3624_v0, %v3529_v49  ;;  %v1980_v25 = vrot.slane %v3624_v0, %v3535_v51  ;;  %v2512_v22 = vcombine.low %v1952_v45, %v1956_v61  ;;  %v2513_v5 = vcombine.low %v1960_v58, %v1964_v63 }
 0x181   :  { %1685 = vperm.xlu1 %3327, %v1546_v60   ;;  %v2447_v12 = vcombine.low %v2438_v3, %v2445_v56  ;;  %v2454_v57 = vrot.slane %v2446_v54, %v3538_v52  ;;  %v2514_v29 = vcombine.low %v1968_v36, %v1972_v4  ;;  %v2016_v6 = vrot.slane %v3643_v16, %v3509_v42 }
 0x182   :  { %v2515_v8 = vcombine.low %v1976_v1, %v1980_v25  ;;  %v2522_v14 = vrot.slane %v2512_v22, %v3538_v52  ;;  %v2529_v19 = vrot.slane %v2513_v5, %v3538_v52  ;;  %v2020_v62 = vrot.slane %v3643_v16, %v3512_v43 }
 0x183   :  { %v2461_v0 = vrot.slane %v2447_v12, %v3538_v52  ;;  %v2536_v17 = vrot.slane %v2514_v29, %v3538_v52  ;;  %v2024_v15 = vrot.slane %v3643_v16, %v3515_v44  ;;  %v2028_v18 = vrot.slane %v3643_v16, %v3520_v46 }
 0x184   :  { %v2543_v2 = vrot.slane %v2515_v8, %v3538_v52  ;;  %v2544_v35 = vcombine.low %v2522_v14, %v2529_v19  ;;  %v2032_v55 = vrot.slane %v3643_v16, %v3523_v47  ;;  %v2036_v13 = vrot.slane %v3643_v16, %v3526_v48 }
 0x185   :  { %v2462_v32 = vcombine.low %v2454_v57, %v2461_v0  ;;  %v2040_v50 = vrot.slane %v3643_v16, %v3529_v49  ;;  %v2044_v39 = vrot.slane %v3643_v16, %v3535_v51  ;;  %v2610_v9 = vcombine.low %v2016_v6, %v2020_v62 }
 0x186   :  { %v2545_v26 = vcombine.low %v2536_v17, %v2543_v2  ;;  %v2552_v37 = vrot.slane %v2544_v35, %v3538_v52  ;;  %v2611_v21 = vcombine.low %v2024_v15, %v2028_v18  ;;  %v2612_v23 = vcombine.low %v2032_v55, %v2036_v13 }
 0x187   :  { %3153 = vperm.xlu1 %3327, %v2462_v32   ;;  %v2613_v40 = vcombine.low %v2040_v50, %v2044_v39  ;;  %v2620_v24 = vrot.slane %v2610_v9, %v3538_v52  ;;  %v2080_v30 = vrot.slane %v3664_v31, %v3509_v42  ;;  %v2084_v10 = vrot.slane %v3664_v31, %v3512_v43 }
 0x188   :  { %v2559_v27 = vrot.slane %v2545_v26, %v3538_v52  ;;  %v2627_v16 = vrot.slane %v2611_v21, %v3538_v52  ;;  %v2634_v59 = vrot.slane %v2612_v23, %v3538_v52  ;;  %v2088_v53 = vrot.slane %v3664_v31, %v3515_v44 }
 0x189   :  { %v2641_v45 = vrot.slane %v2613_v40, %v3538_v52  ;;  %v2092_v61 = vrot.slane %v3664_v31, %v3520_v46  ;;  %v2096_v7 = vrot.slane %v3664_v31, %v3523_v47  ;;  %v2100_v41 = vrot.slane %v3664_v31, %v3526_v48 }
 0x18a   :  { %v2560_v34 = vcombine.low %v2552_v37, %v2559_v27  ;;  %v2642_v28 = vcombine.low %v2620_v24, %v2627_v16  ;;  %v2104_v3 = vrot.slane %v3664_v31, %v3529_v49  ;;  %v2108_v58 = vrot.slane %v3664_v31, %v3535_v51 }
 0x18b   :  { %v2643_v63 = vcombine.low %v2634_v59, %v2641_v45  ;;  %v2708_v36 = vcombine.low %v2080_v30, %v2084_v10  ;;  %v2709_v60 = vcombine.low %v2088_v53, %v2092_v61  ;;  %v2710_v56 = vcombine.low %v2096_v7, %v2100_v41 }
 0x18c   :  { %3159 = vperm.xlu1 %3327, %v2560_v34   ;;  %v2650_v54 = vrot.slane %v2642_v28, %v3538_v52  ;;  %v2711_v4 = vcombine.low %v2104_v3, %v2108_v58  ;;  %v800_v1 = vrot.slane %v3905_v20, %v3509_v42  ;;  %v804_v25 = vrot.slane %v3905_v20, %v3512_v43  ;;  %v1650_v3 = vpop.permute.xlu1 %1649 }
 0x18d   :  { %v2657_v22 = vrot.slane %v2643_v63, %v3538_v52  ;;  %v2718_v5 = vrot.slane %v2708_v36, %v3538_v52  ;;  %v2725_v31 = vrot.slane %v2709_v60, %v3538_v52  ;;  %v2732_v12 = vrot.slane %v2710_v56, %v3538_v52  ;;  %v1647_v56 = vpop.permute.xlu0 %1646 }
 0x18e   :  { %v2739_v57 = vrot.slane %v2711_v4, %v3538_v52  ;;  %v808_v29 = vrot.slane %v3905_v20, %v3515_v44  ;;  %v812_v6 = vrot.slane %v3905_v20, %v3520_v46  ;;  %v816_v8 = vrot.slane %v3905_v20, %v3523_v47 }
 0x18f   :  { %v2658_v14 = vcombine.low %v2650_v54, %v2657_v22  ;;  %v2740_v19 = vcombine.low %v2718_v5, %v2725_v31  ;;  %v820_v62 = vrot.slane %v3905_v20, %v3526_v48  ;;  %v824_v0 = vrot.slane %v3905_v20, %v3529_v49 }
 0x190   :  { %v2741_v17 = vcombine.low %v2732_v12, %v2739_v57  ;;  %v828_v15 = vrot.slane %v3905_v20, %v3535_v51  ;;  %v1547_v18 = vcombine.low %v800_v1, %v804_v25  ;;  %v1548_v2 = vcombine.low %v808_v29, %v812_v6  ;;  %v1653_v58 = vpop.permute.xlu1 %1652 }
 0x191   :  { %3165 = vperm.xlu1 %3327, %v2658_v14   ;;  %v2748_v35 = vrot.slane %v2740_v19, %v3538_v52  ;;  %v1549_v55 = vcombine.low %v816_v8, %v820_v62  ;;  %v832_v13 = vrot.slane %v3972_v11, %v3509_v42  ;;  %v836_v32 = vrot.slane %v3972_v11, %v3512_v43  ;;  %v3151_v4 = vpop.permute.xlu0 %3150 }
 0x192   :  { %v2755_v50 = vrot.slane %v2741_v17, %v3538_v52  ;;  %v1550_v39 = vcombine.low %v824_v0, %v828_v15  ;;  %v1557_v9 = vrot.slane %v1547_v18, %v3538_v52  ;;  %v1564_v26 = vrot.slane %v1548_v2, %v3538_v52 }
 0x193   :  { %v1571_v20 = vrot.slane %v1549_v55, %v3538_v52  ;;  %v840_v37 = vrot.slane %v3972_v11, %v3515_v44  ;;  %v844_v21 = vrot.slane %v3972_v11, %v3520_v46  ;;  %v848_v42 = vrot.slane %v3972_v11, %v3523_v47 }
 0x194   :  { %v2756_v23 = vcombine.low %v2748_v35, %v2755_v50  ;;  %v1578_v43 = vrot.slane %v1550_v39, %v3538_v52  ;;  %v1579_v40 = vcombine.low %v1557_v9, %v1564_v26  ;;  %v852_v24 = vrot.slane %v3972_v11, %v3526_v48  ;;  %v1656_v63 = vpop.permute.xlu1 %1655 }
 0x195   :  { %v856_v30 = vrot.slane %v3972_v11, %v3529_v49  ;;  %v860_v10 = vrot.slane %v3972_v11, %v3535_v51  ;;  %v1596_v44 = vcombine.low %v832_v13, %v836_v32  ;;  %v1597_v27 = vcombine.low %v840_v37, %v844_v21  ;;  %v3157_v25 = vpop.permute.xlu0 %3156 }
 0x196   :  { %3171 = vperm.xlu1 %3327, %v2756_v23   ;;  %v1580_v46 = vcombine.low %v1571_v20, %v1578_v43  ;;  %v1587_v16 = vrot.slane %v1579_v40, %v3538_v52  ;;  %v1598_v47 = vcombine.low %v848_v42, %v852_v24  ;;  %v4501_v19 = vand.u32 127, %v349_v33 }
 0x197   :  { %v1599_v59 = vcombine.low %v856_v30, %v860_v10  ;;  %v1606_v53 = vrot.slane %v1596_v44, %v3538_v52  ;;  %v1613_v45 = vrot.slane %v1597_v27, %v3538_v52  ;;  %vm1704_vm1 = vcmask 130112  }
 0x198   :  { %v1594_v48 = vrot.slane %v1580_v46, %v3538_v52  ;;  %v1620_v61 = vrot.slane %v1598_v47, %v3538_v52  ;;  %v1699_v0 = vadd.s32 4294967288, %v4501_v19  ;;  %v1706_v17 = vadd.s32 4294967280, %v4501_v19 }
 0x199   :  { %v1627_v49 = vrot.slane %v1599_v59, %v3538_v52  ;;  %v1628_v7 = vcombine.low %v1606_v53, %v1613_v45  ;;  %v4484_v5 = vpop.permute.xlu0 %3162  ;;  %v1713_v18 = vadd.s32 4294967272, %v4501_v19  ;;  %v1697_v33 = vsub.s32 %v4501_v19, %v3500_v38 }
 0x19a   :  { %v1595_v51 = vcombine.low %v1587_v16, %v1594_v48  ;;  %v1702_v2 = vsub.s32 %v1699_v0, %v3500_v38  ;;  %v1709_v55 = vsub.s32 %v1706_v17, %v3500_v38  ;;  %v1720_v13 = vadd.s32 4294967264, %v4501_v19 }
 0x19b   :  { %v1629_v11 = vcombine.low %v1620_v61, %v1627_v49  ;;  %v1636_v41 = vrot.slane %v1628_v7, %v3538_v52  ;;  %v1716_v32 = vsub.s32 %v1713_v18, %v3500_v38  ;;  %v1698_v20 = vrot.slane %v1647_v56, %v1697_v33 }
 0x19c   :  { %1688 = vperm.xlu1 %3327, %v1595_v51   ;;  %v1703_v39 = vrot.slane %v1650_v3, %v1702_v2  ;;  %v1710_v9 = vrot.slane %v1653_v58, %v1709_v55  ;;  %vm1711_vm2 = vcmask 195712   ;;  %v1723_v37 = vsub.s32 %v1720_v13, %v3500_v38 }
 0x19d   :  { %v1643_v34 = vrot.slane %v1629_v11, %v3538_v52  ;;  %v1734_v21 = vadd.s32 4294967248, %v4501_v19  ;;  %v3200_v23 = vrot.slane %v3151_v4, %v1697_v33  ;;  %vm1718_vm3 = vcmask 261312  }
 0x19e   :  { %v1717_v43 = vrot.slane %v1656_v63, %v1716_v32  ;;  %v1727_v40 = vadd.s32 4294967256, %v4501_v19  ;;  %v1705_v24 = vsel %vm1704_vm1, %v1703_v39, %v1698_v20  ;;  %v3209_v30 = vrot.slane %v3157_v25, %v1709_v55 }
 0x19f   :  { %v1644_v28 = vcombine.low %v1636_v41, %v1643_v34  ;;  %vm1725_vm4 = vcmask 326912   ;;  %v1748_v10 = vadd.s32 4294967232, %v4501_v19  ;;  %v1712_v27 = vsel %vm1711_vm2, %v1710_v9, %v1705_v24 }
 0x1a0   :  { %v1755_v46 = vadd.s32 4294967224, %v4501_v19  ;;  %v3219_v59 = vrot.slane %v4484_v5, %v1723_v37  ;;  %v1737_v53 = vsub.s32 %v1734_v21, %v3500_v38  ;;  %vm1732_vm5 = vcmask 392512  }
 0x1a1   :  { %1691 = vperm.xlu1 %3327, %v1644_v28   ;;  %v4474_v36 = vpop.permute.xlu1 %1658  ;;  %v1741_v45 = vadd.s32 4294967240, %v4501_v19  ;;  %v1719_v48 = vsel %vm1718_vm3, %v1717_v43, %v1712_v27  ;;  %v1730_v49 = vsub.s32 %v1727_v40, %v3500_v38  ;;  %v1762_v7 = vadd.s32 4294967216, %v4501_v19 }
 0x1a2   :  { %v1724_v61 = vrot.slane %v4474_v36, %v1723_v37  ;;  %v1751_v51 = vsub.s32 %v1748_v10, %v3500_v38  ;;  %vm1739_vm6 = vcmask 458112   ;;  %v1769_v11 = vadd.s32 4294967208, %v4501_v19 }
 0x1a3   :  { %v1758_v28 = vsub.s32 %v1755_v46, %v3500_v38  ;;  %vm1746_vm7 = vcmask 523712   ;;  %v1776_v3 = vadd.s32 4294967200, %v4501_v19  ;;  %v1744_v36 = vsub.s32 %v1741_v45, %v3500_v38 }
 0x1a4   :  { %vm1753_vm8 = vcmask 589312   ;;  %v1783_v56 = vadd.s32 4294967192, %v4501_v19  ;;  %v1726_v25 = vsel %vm1725_vm4, %v1724_v61, %v1719_v48  ;;  %v1765_v5 = vsub.s32 %v1762_v7, %v3500_v38 }
 0x1a5   :  { %v4488_v12 = vpop.permute.xlu0 %3168  ;;  %vm1760_vm9 = vcmask 654912   ;;  %v1790_v0 = vadd.s32 4294967184, %v4501_v19  ;;  %v1772_v17 = vsub.s32 %v1769_v11, %v3500_v38  ;;  %vm1767_vm10 = vcmask 720512  }
 0x1a6   :  { %vm1774_vm11 = vcmask 786112   ;;  %v1779_v55 = vsub.s32 %v1776_v3, %v3500_v38  ;;  %v1797_v33 = vadd.s32 4294967176, %v4501_v19  ;;  %vm1781_vm12 = vcmask 851712  }
 0x1a7   :  { %vm1788_vm13 = vcmask 917312   ;;  %v1793_v20 = vsub.s32 %v1790_v0, %v3500_v38  ;;  %vm1795_vm14 = vcmask 982912   ;;  %vm1802_vm15 = vcmask 1048512  }
 0x1a8   :  { %v1800_v40 = vsub.s32 %v1797_v33, %v3500_v38 }
 0x1ac   :  { %v4476_v60 = vpop.permute.xlu1 %1661 }
 0x1b2   :  { %v4492_v29 = vpop.permute.xlu0 %3174 }
 0x1b7   :  { %v4478_v54 = vpop.permute.xlu1 %1664 }
 0x1bc   :  { %v4496_v8 = vpop.permute.xlu0 %3177 }
 0x1c1   :  { %v4480_v1 = vpop.permute.xlu1 %1667 }
 0x1c2   :  { %v1745_v21 = vrot.slane %v4480_v1, %v1744_v36 }
 0x1c7   :  { %v4503_v62 = vpop.permute.xlu0 %3180 }
 0x1cc   :  { %v4482_v22 = vpop.permute.xlu1 %1670 }
 0x1cd   :  { %v1752_v43 = vrot.slane %v4482_v22, %v1751_v51 }
 0x1d1   :  { %v4511_v35 = vpop.permute.xlu0 %3183 }
 0x1d6   :  { %v4486_v31 = vpop.permute.xlu1 %1673 }
 0x1d7   :  { %v1759_v10 = vrot.slane %v4486_v31, %v1758_v28 }
 0x1dc   :  { %v4520_v42 = vpop.permute.xlu0 %3186 }
 0x1dd   :  { %v3259_v46 = vrot.slane %v4520_v42, %v1779_v55 }
 0x1e1   :  { %v4490_v57 = vpop.permute.xlu1 %1676 }
 0x1e6   :  { %v4537_v41 = vpop.permute.xlu0 %3189 }
 0x1eb   :  { %v4494_v6 = vpop.permute.xlu1 %1679 }
 0x1f1   :  { %v3193_v39 = vpop.permute.xlu0 %3192 }
 0x1f2   :  { %v3269_v48 = vrot.slane %v3193_v39, %v1793_v20 }
 0x1f6   :  { %v4498_v14 = vpop.permute.xlu1 %1682 }
 0x200   :  { %v4507_v15 = vpop.permute.xlu1 %1685 }
 0x206   :  { %v3154_v50 = vpop.permute.xlu1 %3153 }
 0x207   :  { %v3204_v26 = vrot.slane %v3154_v50, %v1702_v2  ;;  %v3229_v2 = vrot.slane %v4488_v12, %v1737_v53  ;;  %v1786_v50 = vsub.s32 %v1783_v56, %v3500_v38  ;;  %v3239_v12 = vrot.slane %v4492_v29, %v1751_v51 }
 0x209   :  { %v3205_v16 = vsel %vm1704_vm1, %v3204_v26, %v3200_v23  ;;  %v1738_v26 = vrot.slane %v4478_v54, %v1737_v53  ;;  %v3264_v53 = vrot.slane %v4537_v41, %v1786_v50  ;;  %v1787_v61 = vrot.slane %v4507_v15, %v1786_v50 }
 0x20a   :  { %v3210_v34 = vsel %vm1711_vm2, %v3209_v30, %v3205_v16  ;;  %v3249_v30 = vrot.slane %v4503_v62, %v1765_v5  ;;  %v1773_v16 = vrot.slane %v4494_v6, %v1772_v17 }
 0x20b   :  { %v3160_v44 = vpop.permute.xlu1 %3159 }
 0x20c   :  { %v3214_v47 = vrot.slane %v3160_v44, %v1716_v32  ;;  %v1731_v32 = vrot.slane %v4476_v60, %v1730_v49  ;;  %v3244_v60 = vrot.slane %v4496_v8, %v1758_v28  ;;  %v3254_v44 = vrot.slane %v4511_v35, %v1772_v17 }
 0x20d   :  { %v1766_v8 = vrot.slane %v4490_v57, %v1765_v5  ;;  %v1780_v35 = vrot.slane %v4498_v14, %v1779_v55  ;;  %v172_v14 = vld [vmem:[%s4616_s2] sm:$0x1]  ;;  %s3438_s2 = smov [#allocation7]  }
 0x20e   :  { %v3215_v58 = vsel %vm1718_vm3, %v3214_v47, %v3210_v34  ;;  %v1733_v54 = vsel %vm1732_vm5, %v1731_v32, %v1726_v25  ;;  %v3196_v47 = vpop.permute.xlu0 %3195  ;;  %s3309_s13 = sshll.u32 %s3438_s2, 4  ;;  %s3310_s13 = int_to_ptr.vmem [resolvable:$true] %s3309_s13 }
 0x20f   :  { %v3220_v18 = vsel %vm1725_vm4, %v3219_v59, %v3215_v58  ;;  %v1740_v1 = vsel %vm1739_vm6, %v1738_v26, %v1733_v54  ;;  %s3404_s14 = scalar_lea.vmem %s3310_s13, 16  ;;  %s3408_s15 = scalar_lea.vmem %s3310_s13, 32 }
 0x210   :  { %v3166_v63 = vpop.permute.xlu1 %3165  ;;  %v1747_v27 = vsel %vm1746_vm7, %v1745_v21, %v1740_v1  ;;  %p3405_p2 = scmp.ne.s32.totalorder %s3310_s13, %s3404_s14  ;;  %p3409_p3 = scmp.lt.s32.totalorder %s3310_s13, %s3310_s13 }
 0x211   :  { %v3224_v4 = vrot.slane %v3166_v63, %v1730_v49  ;;  %v1754_v59 = vsel %vm1753_vm8, %v1752_v43, %v1747_v27  ;;  %v3274_v49 = vrot.slane %v3196_v47, %v1800_v40  ;;  %p3410_p4 = scmp.lt.s32.totalorder %s3408_s15, %s3404_s14 }
 0x212   :  { %v1761_v45 = vsel %vm1760_vm9, %v1759_v10, %v1754_v59 }
 0x213   :  { %v3225_v13 = vsel %vm1732_vm5, %v3224_v4, %v3220_v18  ;;  %v1768_v6 = vsel %vm1767_vm10, %v1766_v8, %v1761_v45  ;;  %v1820_v4 = vsub.f32 1.0, %v172_v14  ;;  %p3411_p5 = por %p3410_p4, %p3409_p3 }
 0x214   :  { %v3230_v23 = vsel %vm1739_vm6, %v3229_v2, %v3225_v13  ;;  %v1775_v11 = vsel %vm1774_vm11, %v1773_v16, %v1768_v6 }
 0x215   :  { %v3172_v9 = vpop.permute.xlu1 %3171  ;;  %v1782_v34 = vsel %vm1781_vm12, %v1780_v35, %v1775_v11  ;;  %p3412_p6 = pnand %p3411_p5, %p3405_p2 }
 0x216   :  { %v3234_v37 = vrot.slane %v3172_v9, %v1744_v36  ;;  %v1789_v3 = vsel %vm1788_vm13, %v1787_v61, %v1782_v34  ;;  %v3296_v36 = vmul.u32 128, %v3500_v38 }
 0x218   :  { %v3235_v24 = vsel %vm1746_vm7, %v3234_v37, %v3230_v23  ;;  %v3299_v17 = vadd.s32 %v3296_v36, %v4501_v19 }
 0x219   :  { %v3240_v29 = vsel %vm1753_vm8, %v3239_v12, %v3235_v24 }
 0x21a   :  { %v3245_v22 = vsel %vm1760_vm9, %v3244_v60, %v3240_v29  ;;  %vm3300_vm0 = vcmp.lt.s32.totalorder %v3299_v17, 10 }
 0x21b   :  { %v3250_v62 = vsel %vm1767_vm10, %v3249_v30, %v3245_v22  ;;  %v1689_v31 = vpop.permute.xlu1 %1688 }
 0x21c   :  { %v3255_v57 = vsel %vm1774_vm11, %v3254_v44, %v3250_v62  ;;  %v1794_v7 = vrot.slane %v1689_v31, %v1793_v20 }
 0x21d   :  { %v3260_v42 = vsel %vm1781_vm12, %v3259_v46, %v3255_v57 }
 0x21e   :  { %v3265_v51 = vsel %vm1788_vm13, %v3264_v53, %v3260_v42  ;;  %v1796_v56 = vsel %vm1795_vm14, %v1794_v7, %v1789_v3 }
 0x21f   :  { %v3270_v41 = vsel %vm1795_vm14, %v3269_v48, %v3265_v51 }
 0x220   :  { %v1692_v28 = vpop.permute.xlu1 %1691  ;;  %v3275_v15 = vsel %vm1802_vm15, %v3274_v49, %v3270_v41 }
 0x221   :  { %v1801_v58 = vrot.slane %v1692_v28, %v1800_v40  ;;  %v3282_v63 = vrot.slane %v3275_v15, %v3538_v52 }
 0x223   :  { %v1803_v25 = vsel %vm1802_vm15, %v1801_v58, %v1796_v56  ;;  %v3289_v5 = vrot.slane %v3282_v63, %v3538_v52 }
 0x224   :  { %v1810_v0 = vrot.slane %v1803_v25, %v3538_v52 }
 0x225   :  { %v3291_v2 = vmul.f32 %v3289_v5, %v1820_v4 }
 0x226   :  { %v1817_v18 = vrot.slane %v1810_v0, %v3538_v52 }
 0x228   :  { %v1819_v55 = vmul.f32 %v1817_v18, %v172_v14 }
 0x22a   :  { %v3292_v33 = vadd.f32 %v3291_v2, %v1819_v55 }
 0x22c   :  { %v3301_v38 = vsel %vm3300_vm0, %v3292_v33, 0.0 }
 0x22d   :  { %3302 = vst [vmem:[#allocation7] sm:$0x1] %v3301_v38 }
 0x22e   :  { %3415 = shalt.err (!%p3412_p6)
}
 0x22f   :  { %s3416_s18 = scalar_lea.hbm %s4617_s3, 16 }
 0x230   :  { %p3417_p7 = scmp.ne.s32.totalorder %s4617_s3, %s3416_s18  ;;  %p3420_p8 = scmp.lt.u32.totalorder %s3416_s18, %s4617_s3 }
 0x232   :  { %p3422_p9 = pnand %p3420_p8, %p3417_p7 }
 0x234   :  { %3425 = shalt.err (!%p3422_p9)
}
 0x235   :  { %3312 = dma.vmem_to_hbm [thread:$0]  %s3310_s13, 16, %s4617_s3, [#allocation4]  }
 0x236   :  { %3430 = dma.done.wait [#allocation4], 16  }
 0x237   :  { %3431 = vsyncadd [#allocation4], 4294967280 }
 0x238   :  { %3316 = vsyncpa [#allocation3], 1 }
 0x239   :  { %3317 = vsyncpa [#allocation6], 1 }
 0x23a   :  { %3318 = vsyncpa [#allocation4], 1 }

// kernel: tpu_custom_call.1
= control target key start
LH: loop header
LB: loop body
LE: loop exit
PB: predicated region body
PF: predicated region fallthrough
CT: control target
= control target key end

     0   :  { %8 = vsyncpa [#allocation3], 0  ;;  %s658_s0 = inlined_call_operand.vmem [shape: f32[10,32], index: 0, kind: input, shape index: {}]   ;;  %s659_s1 = inlined_call_operand.hbm [shape: f32[10,32], index: 1, kind: input, shape index: {}]   ;;  %s660_s2 = inlined_call_operand.vmem [shape: f32[10,1], index: 2, kind: input, shape index: {}]   ;;  %s661_s3 = inlined_call_operand.hbm [shape: f32[8,128], index: 3, kind: output, shape index: {}]  }
   0x1   :  { %9 = vsyncpa [#allocation4], 0 }
   0x2   :  { %16 = vsyncadd [#allocation3], 1792  ;;  %s598_s12 = smov [#allocation2]   ;;  %s550_s16 = scalar_lea.hbm %s659_s1, 256 }
   0x3   :  { %s17_s13 = sshll.u32 %s598_s12, 4  ;;  %p551_p0 = scmp.ne.s32.totalorder %s659_s1, %s550_s16  ;;  %s18_s13 = int_to_ptr.vmem [resolvable:$true] %s17_s13 }
   0x4   :  { %p554_p1 = scmp.lt.u32.totalorder %s550_s16, %s659_s1 }
   0x6   :  { %p556_p2 = pnand %p554_p1, %p551_p0 }
   0x8   :  { %559 = shalt.err (!%p556_p2)
}
   0x9   :  { %s560_s21 = scalar_lea.vmem %s18_s13, 256  ;;  %s564_s22 = scalar_lea.vmem %s18_s13, 2048 }
   0xa   :  { %p561_p3 = scmp.ne.s32.totalorder %s18_s13, %s560_s21  ;;  %p565_p4 = scmp.lt.s32.totalorder %s18_s13, %s18_s13 }
   0xb   :  { %p566_p5 = scmp.lt.s32.totalorder %s564_s22, %s560_s21 }
   0xd   :  { %p567_p6 = por %p566_p5, %p565_p4 }
   0xf   :  { %p568_p7 = pnand %p567_p6, %p561_p3 }
  0x11   :  { %571 = shalt.err (!%p568_p7)
}
  0x12   :  { %s599_s23 = smov 128   ;;  %s600_s24 = smov 8  }
  0x13   :  { %23 = dma.hbm_to_vmem [thread:$0]  %s659_s1, 256, %s18_s13, [#allocation3], %s599_s23, %s599_s23, %s600_s24  }
  0x14   :  { %594 = dma.done.wait [#allocation3], 2048  }
  0x15   :  { %595 = vsyncadd [#allocation3], 4294965248  ;;  %v30_v0 = vld [vmem:[%s658_s0 + $0x8] sm:$0xff]  ;;  %v29_v2 = vld [vmem:[%s658_s0] sm:$0xff]  ;;  %vm125_vm0 = vcmask 261120   ;;  %v415_v16 = vlaneseq  ;;  %vm481_vm6 = vcmask 7168  }
  0x16   :  { %v46_v1 = vld [vmem:[#allocation2 + $0x8] sm:$0xff]  ;;  %v45_v4 = vld [vmem:[#allocation2] sm:$0xff] }
  0x17   :  { %v78_v3 = vsub.f32 %v30_v0, %v46_v1  ;;  %v77_v5 = vsub.f32 %v29_v2, %v45_v4  ;;  %v62_v22 = vld [vmem:[%s660_s2 + $0x8] sm:$0xff]  ;;  %v416_v24 = vshrl.u32 %v415_v16, 7  ;;  %v61_v31 = vld [vmem:[%s660_s2] sm:$0xff]  ;;  %s601_s2 = smov [#allocation5]  }
  0x18   :  { %v351_v26 = vsub.f32 1.0, %v62_v22  ;;  %v350_v35 = vsub.f32 1.0, %v61_v31  ;;  %s531_s6 = sshll.u32 %s601_s2, 4  ;;  %s532_s6 = int_to_ptr.vmem [resolvable:$true] %s531_s6 }
  0x19   :  { %v94_v6 = vadd.f32 1e-06, %v78_v3  ;;  %v93_v7 = vadd.f32 1e-06, %v77_v5  ;;  %v417_v34 = vadd.s32 8, %v416_v24  ;;  %s572_s8 = scalar_lea.vmem %s532_s6, 128  ;;  %p577_p9 = scmp.lt.s32.totalorder %s532_s6, %s532_s6 }
  0x1a   :  { %p573_p8 = scmp.ne.s32.totalorder %s532_s6, %s572_s8  ;;  %p578_p10 = scmp.lt.s32.totalorder %s572_s8, %s572_s8 }
  0x1b   :  { %v110_v8 = vmul.f32 %v94_v6, %v94_v6  ;;  %v109_v9 = vmul.f32 %v93_v7, %v93_v7  ;;  %vm450_vm5 = vcmp.lt.s32.totalorder %v417_v34, 10 }
  0x1c   :  { %p579_p11 = por %p578_p10, %p577_p9 }
  0x1d   :  { %v129_v10 = vsel %vm125_vm0, %v110_v8, 0.0  ;;  %v126_v11 = vsel %vm125_vm0, %v109_v9, 0.0 }
  0x1e   :  { %130 = vadd.xlane.f32.xlu0 %v129_v10  ;;  %p580_p12 = pnand %p579_p11, %p573_p8 }
  0x22   :  { %127 = vadd.xlane.f32.xlu0 %v126_v11 }
  0xab   :  { %v131_v12 = vpop.xlane.xlu0 %130 }
  0xac   :  { %546 = vrsqrt.f32 %v131_v12  ;;  %vm183_vm1 = vcmp.eq.f32.partialorder %v131_v12, inf  ;;  %v186_v17 = vand.u32 2147483648, %v131_v12  ;;  %vm185_vm2 = vcmp.eq.f32.partialorder %v131_v12, 0.0 }
  0xaf   :  { %v128_v13 = vpop.xlane.xlu0 %127 }
  0xb0   :  { %548 = vrsqrt.f32 %v128_v13  ;;  %vm176_vm3 = vcmp.eq.f32.partialorder %v128_v13, inf  ;;  %v179_v25 = vand.u32 2147483648, %v128_v13  ;;  %vm178_vm4 = vcmp.eq.f32.partialorder %v128_v13, 0.0 }
  0xb6   :  { %v547_v14 = vpop.eup %546 }
  0xb7   :  { %v182_v15 = vmul.f32 %v547_v14, %v131_v12 }
  0xb9   :  { %v184_v18 = vsel %vm183_vm1, %v131_v12, %v182_v15 }
  0xba   :  { %v549_v19 = vpop.eup %548  ;;  %v187_v20 = vsel %vm185_vm2, %v186_v17, %v184_v18 }
  0xbb   :  { %v175_v21 = vmul.f32 %v549_v19, %v128_v13  ;;  %v287_v23 = vsub.f32 2.0, %v187_v20  ;;  %v319_v29 = vmul.f32 %v187_v20, %v187_v20 }
  0xbd   :  { %v177_v27 = vsel %vm176_vm3, %v128_v13, %v175_v21  ;;  %v303_v28 = vmax.f32 %v287_v23, 0.0  ;;  %v335_v38 = vmul.f32 %v319_v29, %v62_v22 }
  0xbe   :  { %v180_v30 = vsel %vm178_vm4, %v179_v25, %v177_v27 }
  0xbf   :  { %v286_v32 = vsub.f32 2.0, %v180_v30  ;;  %v367_v33 = vmul.f32 %v303_v28, %v303_v28  ;;  %v318_v37 = vmul.f32 %v180_v30, %v180_v30 }
  0xc1   :  { %v302_v36 = vmax.f32 %v286_v32, 0.0  ;;  %v383_v39 = vmul.f32 %v367_v33, %v351_v26  ;;  %v334_v42 = vmul.f32 %v318_v37, %v61_v31 }
  0xc3   :  { %v366_v40 = vmul.f32 %v302_v36, %v302_v36  ;;  %v399_v41 = vadd.f32 %v383_v39, %v335_v38 }
  0xc5   :  { %v382_v43 = vmul.f32 %v366_v40, %v350_v35  ;;  %v466_v44 = vsel %vm450_vm5, %v399_v41, 0.0 }
  0xc6   :  { %v483_v47 = vsel %vm481_vm6, %v466_v44, 0.0 }
  0xc7   :  { %v398_v45 = vadd.f32 %v382_v43, %v334_v42 }
  0xc9   :  { %v482_v46 = vsel %vm481_vm6, %v398_v45, 0.0 }
  0xca   :  { %v484_v48 = vadd.f32 %v483_v47, %v482_v46 }
  0xcc   :  { %513 = vadd.xlane.f32.xlu1 %v484_v48 }
 0x159   :  { %v514_v49 = vpop.xlane.xlu1 %513 }
 0x15a   :  { %v515_v50 = vrot.slane %v514_v49, 4 }
 0x15c   :  { %v516_v51 = vadd.f32 %v515_v50, %v514_v49 }
 0x15e   :  { %v517_v52 = vrot.slane %v516_v51, 2 }
 0x160   :  { %v518_v53 = vadd.f32 %v517_v52, %v516_v51 }
 0x162   :  { %v519_v54 = vrot.slane %v518_v53, 1 }
 0x164   :  { %v520_v55 = vadd.f32 %v519_v54, %v518_v53 }
 0x166   :  { %540 = vpush %v520_v55 }
 0x197   :  { %s541_s7 = spop %540 }
 0x198   :  { %v522_v56 = vstv %s541_s7 }
 0x199   :  { %524 = vst [vmem:[#allocation5] sm:$0xff] %v522_v56 }
 0x19a   :  { %583 = shalt.err (!%p580_p12)
}
 0x19b   :  { %s584_s11 = scalar_lea.hbm %s661_s3, 128 }
 0x19c   :  { %p585_p13 = scmp.ne.s32.totalorder %s661_s3, %s584_s11  ;;  %p588_p0 = scmp.lt.u32.totalorder %s584_s11, %s661_s3 }
 0x19e   :  { %p590_p1 = pnand %p588_p0, %p585_p13 }
 0x1a0   :  { %593 = shalt.err (!%p590_p1)
}
 0x1a1   :  { %534 = dma.vmem_to_hbm [thread:$0]  %s532_s6, 128, %s661_s3, [#allocation4]  }
 0x1a2   :  { %596 = dma.done.wait [#allocation4], 128  }
 0x1a3   :  { %597 = vsyncadd [#allocation4], 4294967168 }
 0x1a4   :  { %538 = vsyncpa [#allocation3], 1 }
 0x1a5   :  { %539 = vsyncpa [#allocation4], 1 }

</bundles_post_ra>
